<compile_context>
chip_gen: v7x
topology: tpu7x:2x2x1
jax: 0.10.0
libtpu: 0.0.40
codegen_flags: <defaults>
</compile_context>

<pallas_src>
import functools

import jax
import jax.numpy as jnp
from jax import lax
from jax.experimental import pallas as pl
from jax.experimental.pallas import tpu as pltpu


def _round_up(x, m):
    return ((x + m - 1) // m) * m


def _fused_conv_block_kernel(
    xa_ref, xb_ref, w1_ref, w2_ref, s1_ref, b1_ref, s2_ref, b2_ref, o_ref,
    *, stride, ksize, pad, l_tile, m1, l_mid,
):
    """One (batch, L-tile) grid step of Conv1d+BN+ReLU -> Conv1d+BN+ReLU.

    xa_ref, xb_ref: (1, l_tile*stride, Cin) two consecutive blocks of the zero-padded
                    input, together covering this tile's receptive field (incl. halo).
    w1_ref: (K, Cin, Cout)   tap-major stage-1 weight.
    w2_ref: (K, Cout, Cout)  tap-major stage-2 weight.
    s*_ref, b*_ref: (1, Cout) folded BN scale/shift (float32).
    o_ref:  (1, Cout, l_tile) output tile, already in PyTorch NCL layout.
    """
    t = pl.program_id(1)
    cin = xa_ref.shape[-1]
    cout = o_ref.shape[1]

    # Receptive-field window for this tile (halo rows come from the second block).
    xw = jnp.concatenate([xa_ref[0], xb_ref[0]], axis=0)      # (2*l_tile*stride, Cin)

    # ---- stage 1: conv (stride s) + BN + ReLU over m1 ~ l_tile + K - 1 rows ----
    acc1 = jnp.zeros((m1, cout), jnp.float32)
    for k in range(ksize):                 # static unroll; one MXU matmul per tap
        if stride == 1:
            xk = lax.slice(xw, (k, 0), (k + m1, cin))
        else:
            # TODO(synk): for stride > 1 the stride could be applied at DMA time
            # instead of with a strided in-register slice.
            xk = lax.slice(xw, (k, 0), (k + (m1 - 1) * stride + 1, cin), (stride, 1))
        acc1 = acc1 + jnp.dot(xk, w1_ref[k], preferred_element_type=jnp.float32)
    y1 = jnp.maximum(acc1 * s1_ref[...] + b1_ref[...], 0.0)

    # Zero the rows falling outside the true stage-1 output range: they double as
    # stage-2 zero padding at the sequence edges, keeping the tile fusion exact.
    row = lax.broadcasted_iota(jnp.int32, (m1, cout), 0) + (t * l_tile - pad)
    y1 = jnp.where((row >= 0) & (row < l_mid), y1, 0.0)
    y1 = y1.astype(xw.dtype)               # bf16 (or f32) for the second MXU pass

    # ---- stage 2: conv (stride 1) + BN + ReLU over the l_tile output rows ----
    acc2 = jnp.zeros((l_tile, cout), jnp.float32)
    for k in range(ksize):
        yk = lax.slice(y1, (k, 0), (k + l_tile, cout))
        acc2 = acc2 + jnp.dot(yk, w2_ref[k], preferred_element_type=jnp.float32)
    y2 = jnp.maximum(acc2 * s2_ref[...] + b2_ref[...], 0.0)    # (l_tile, Cout) f32

    # (l_tile, Cout) -> (Cout, l_tile) with a tiny identity matmul on the MXU, so the
    # store is lane-dense over L and the wrapper needs no output transpose pass.
    eye = (lax.broadcasted_iota(jnp.int32, (cout, cout), 0)
           == lax.broadcasted_iota(jnp.int32, (cout, cout), 1)).astype(jnp.float32)
    y2_t = lax.dot_general(eye, y2, (((1,), (1,)), ((), ())),
                           preferred_element_type=jnp.float32)  # (Cout, l_tile)
    o_ref[0] = y2_t.astype(o_ref.dtype)


def basic_conv_block_1d(x_ncl, params, *, stride=1, eps=1e-5, l_tile=512,
                        compute_dtype=jnp.bfloat16):
    """Forward pass of BasicConvBlock1D. x_ncl: (N, Cin, L) -> (N, Cout, L_out)."""
    n, cin, length = x_ncl.shape
    cout, _, ksize = params["w1"].shape
    pad = ksize // 2

    l_mid = (length + 2 * pad - ksize) // stride + 1    # stage-1 output length
    l_out = l_mid + 2 * pad - ksize + 1                 # stage-2 output length

    # --- tiling (lane-dense 128-multiple L tiles; ~512 rows when L is large) ---
    lt = min(_round_up(l_out, 128), _round_up(l_tile, 128))
    num_tiles = -(-l_out // lt)
    m1 = _round_up(lt + ksize - 1, 8)        # stage-1 rows computed per tile
    b_in = lt * stride                       # input rows per L block
    halo_left = pad * stride + pad           # input rows needed before a tile's start
    assert (m1 - 1) * stride + ksize <= 2 * b_in, "L tile too small for the conv halo"

    # Pad L so (a) every tile's two input blocks exist and (b) every out-of-range row
    # the kernel can touch is zero (those zeros double as the convs' zero padding).
    l_padded = b_in * max(num_tiles + 1, -(-(halo_left + length) // b_in))

    x_nlc = jnp.transpose(x_ncl, (0, 2, 1)).astype(compute_dtype)
    x_pad = jnp.pad(x_nlc, ((0, 0), (halo_left, l_padded - halo_left - length), (0, 0)))

    # Tap-major weights: (Cout, Cin, K) -> (K, Cin, Cout).
    w1 = jnp.transpose(params["w1"], (2, 1, 0)).astype(compute_dtype)
    w2 = jnp.transpose(params["w2"], (2, 1, 0)).astype(compute_dtype)

    # Inference-mode BN folded into per-channel scale/shift (kept in float32).
    scale1 = (params["bn1_gamma"] / jnp.sqrt(params["bn1_var"] + eps)).astype(jnp.float32)
    shift1 = (params["bn1_beta"] - params["bn1_mean"] * scale1).astype(jnp.float32)
    scale2 = (params["bn2_gamma"] / jnp.sqrt(params["bn2_var"] + eps)).astype(jnp.float32)
    shift2 = (params["bn2_beta"] - params["bn2_mean"] * scale2).astype(jnp.float32)
    scale1 = scale1.reshape(1, cout)
    shift1 = shift1.reshape(1, cout)
    scale2 = scale2.reshape(1, cout)
    shift2 = shift2.reshape(1, cout)

    kernel = functools.partial(
        _fused_conv_block_kernel,
        stride=stride, ksize=ksize, pad=pad, l_tile=lt, m1=m1, l_mid=l_mid)

    itemsize = jnp.dtype(compute_dtype).itemsize
    cost = pl.CostEstimate(
        flops=2 * n * num_tiles * ksize * (m1 * cin * cout + lt * cout * cout),
        transcendentals=0,
        bytes_accessed=(n * num_tiles * 2 * b_in * cin * itemsize     # input (+halo reread)
                        + n * num_tiles * cout * lt * 4               # output
                        + (w1.size + w2.size) * itemsize + 4 * cout * 4),
    )

    out_padded = pl.pallas_call(
        kernel,
        out_shape=jax.ShapeDtypeStruct((n, cout, num_tiles * lt), jnp.float32),
        grid=(n, num_tiles),
        in_specs=[
            pl.BlockSpec((1, b_in, cin), lambda i, t: (i, t, 0)),        # tile block
            pl.BlockSpec((1, b_in, cin), lambda i, t: (i, t + 1, 0)),    # halo block
            pl.BlockSpec((ksize, cin, cout), lambda i, t: (0, 0, 0)),    # w1
            pl.BlockSpec((ksize, cout, cout), lambda i, t: (0, 0, 0)),   # w2
            pl.BlockSpec((1, cout), lambda i, t: (0, 0)),                # bn1 scale
            pl.BlockSpec((1, cout), lambda i, t: (0, 0)),                # bn1 shift
            pl.BlockSpec((1, cout), lambda i, t: (0, 0)),                # bn2 scale
            pl.BlockSpec((1, cout), lambda i, t: (0, 0)),                # bn2 shift
        ],
        out_specs=pl.BlockSpec((1, cout, lt), lambda i, t: (i, 0, t)),
        compiler_params=pltpu.CompilerParams(
            dimension_semantics=("parallel", "parallel"),
            vmem_limit_bytes=32 * 1024 * 1024,
        ),
        cost_estimate=cost,
    )(x_pad, x_pad, w1, w2, scale1, shift1, scale2, shift2)

    if num_tiles * lt != l_out:
        out_padded = out_padded[:, :, :l_out]
    return out_padded


def init_params(key, in_channel, out_channel, kernel_size):
    """Deterministic synthetic parameters matching the PyTorch module's shapes."""
    ks = jax.random.split(key, 10)
    w1 = jax.random.normal(ks[0], (out_channel, in_channel, kernel_size), jnp.float32)
    w1 = w1 * (1.0 / jnp.sqrt(in_channel * kernel_size))
    w2 = jax.random.normal(ks[1], (out_channel, out_channel, kernel_size), jnp.float32)
    w2 = w2 * (1.0 / jnp.sqrt(out_channel * kernel_size))
    return {
        "w1": w1,
        "w2": w2,
        "bn1_gamma": 1.0 + 0.1 * jax.random.normal(ks[2], (out_channel,), jnp.float32),
        "bn1_beta": 0.1 * jax.random.normal(ks[3], (out_channel,), jnp.float32),
        "bn1_mean": 0.1 * jax.random.normal(ks[4], (out_channel,), jnp.float32),
        "bn1_var": jnp.abs(1.0 + 0.1 * jax.random.normal(ks[5], (out_channel,), jnp.float32)),
        "bn2_gamma": 1.0 + 0.1 * jax.random.normal(ks[6], (out_channel,), jnp.float32),
        "bn2_beta": 0.1 * jax.random.normal(ks[7], (out_channel,), jnp.float32),
        "bn2_mean": 0.1 * jax.random.normal(ks[8], (out_channel,), jnp.float32),
        "bn2_var": jnp.abs(1.0 + 0.1 * jax.random.normal(ks[9], (out_channel,), jnp.float32)),
    }


def reference_forward(x_ncl, params, *, stride=1, eps=1e-5):
    """Pure-JAX/XLA reference of the PyTorch module (inference-mode BN)."""
    def conv1d(x, w, s):
        return lax.conv_general_dilated(
            x, w, window_strides=(s,),
            padding=[(w.shape[-1] // 2, w.shape[-1] // 2)],
            dimension_numbers=("NCH", "OIH", "NCH"),
            precision=lax.Precision.HIGHEST)

    def bn_relu(x, g, b, m, v):
        y = (x - m[None, :, None]) * (g / jnp.sqrt(v + eps))[None, :, None] + b[None, :, None]
        return jnp.maximum(y, 0.0)

    y = bn_relu(conv1d(x_ncl, params["w1"], stride),
                params["bn1_gamma"], params["bn1_beta"],
                params["bn1_mean"], params["bn1_var"])
    y = bn_relu(conv1d(y, params["w2"], 1),
                params["bn2_gamma"], params["bn2_beta"],
                params["bn2_mean"], params["bn2_var"])
    return y


if __name__ == "__main__":
    N, C_IN, C_OUT, L = 2, 4, 8, 16
    KERNEL_SIZE, STRIDE = 7, 1

    key = jax.random.PRNGKey(0)
    k_x, k_p = jax.random.split(key)
    x = jax.random.normal(k_x, (N, C_IN, L), jnp.float32)       # PyTorch NCL input
    params = init_params(k_p, C_IN, C_OUT, KERNEL_SIZE)

    ref = reference_forward(x, params, stride=STRIDE)

    # float32 compute path: tight check against the pure-JAX reference.
    out_f32 = jax.block_until_ready(
        basic_conv_block_1d(x, params, stride=STRIDE, compute_dtype=jnp.float32))
    assert out_f32.shape == ref.shape == (N, C_OUT, L), (out_f32.shape, ref.shape)
    assert bool(jnp.all(out_f32 >= 0.0))
    err_f32 = float(jnp.max(jnp.abs(out_f32 - ref)))
    assert err_f32 < 2e-2, f"f32 max abs err {err_f32}"

    # bf16 MXU path (default, v6e/v7x-friendly): loose check.
    out_bf16 = jax.block_until_ready(
        basic_conv_block_1d(x, params, stride=STRIDE, compute_dtype=jnp.bfloat16))
    assert out_bf16.shape == (N, C_OUT, L)
    assert bool(jnp.all(out_bf16 >= 0.0))
    err_bf16 = float(jnp.max(jnp.abs(out_bf16 - ref)))
    assert err_bf16 < 1.5e-1, f"bf16 max abs err {err_bf16}"

    print("KERNEL_OK")
</pallas_src>

<mosaic_0001>
module attributes {stable_mosaic.version = 11 : i64} {
  func.func @_fused_conv_block_kernel(%arg0: i32, %arg1: i32, %arg2: memref<1x128x4xf32, #tpu.memory_space<vmem>>, %arg3: memref<1x128x4xf32, #tpu.memory_space<vmem>>, %arg4: memref<7x4x8xf32, #tpu.memory_space<vmem>>, %arg5: memref<7x8x8xf32, #tpu.memory_space<vmem>>, %arg6: memref<1x8xf32, #tpu.memory_space<vmem>>, %arg7: memref<1x8xf32, #tpu.memory_space<vmem>>, %arg8: memref<1x8xf32, #tpu.memory_space<vmem>>, %arg9: memref<1x8xf32, #tpu.memory_space<vmem>>, %arg10: memref<1x8x128xf32, #tpu.memory_space<vmem>>) attributes {dimension_semantics = [#tpu.dimension_semantics<parallel>, #tpu.dimension_semantics<parallel>], iteration_bounds = array<i64: 2, 1>, scalar_prefetch = 0 : i64, scratch_operands = 0 : i64, tpu.core_type = #tpu.core_type<tc>, window_params = [{transform_indices = @transform_0, window_bounds = array<i64: 1, 128, 4>}, {transform_indices = @transform_1, window_bounds = array<i64: 1, 128, 4>}, {pipeline_mode = #tpu.pipeline_mode<synchronous>, transform_indices = @transform_2, window_bounds = array<i64: 7, 4, 8>}, {pipeline_mode = #tpu.pipeline_mode<synchronous>, transform_indices = @transform_3, window_bounds = array<i64: 7, 8, 8>}, {pipeline_mode = #tpu.pipeline_mode<synchronous>, transform_indices = @transform_4, window_bounds = array<i64: 1, 8>}, {pipeline_mode = #tpu.pipeline_mode<synchronous>, transform_indices = @transform_5, window_bounds = array<i64: 1, 8>}, {pipeline_mode = #tpu.pipeline_mode<synchronous>, transform_indices = @transform_6, window_bounds = array<i64: 1, 8>}, {pipeline_mode = #tpu.pipeline_mode<synchronous>, transform_indices = @transform_7, window_bounds = array<i64: 1, 8>}, {transform_indices = @transform_8, window_bounds = array<i64: 1, 8, 128>}]} {
    %c0 = arith.constant 0 : index
    %c0_0 = arith.constant 0 : index
    %c0_1 = arith.constant 0 : index
    %0 = vector.load %arg2[%c0, %c0_0, %c0_1] : memref<1x128x4xf32, #tpu.memory_space<vmem>>, vector<1x128x4xf32>
    %1 = vector.shape_cast %0 : vector<1x128x4xf32> to vector<128x4xf32>
    %c0_2 = arith.constant 0 : index
    %c0_3 = arith.constant 0 : index
    %c0_4 = arith.constant 0 : index
    %2 = vector.load %arg3[%c0_2, %c0_3, %c0_4] : memref<1x128x4xf32, #tpu.memory_space<vmem>>, vector<1x128x4xf32>
    %3 = vector.shape_cast %2 : vector<1x128x4xf32> to vector<128x4xf32>
    %4 = tpu.concatenate %1, %3 in 0 : vector<128x4xf32>, vector<128x4xf32> -> vector<256x4xf32>
    %cst = arith.constant 0.000000e+00 : f32
    %5 = vector.broadcast %cst : f32 to vector<136x8xf32>
    %6 = vector.extract_strided_slice %4 {offsets = [0, 0], sizes = [136, 4], strides = [1, 1]} : vector<256x4xf32> to vector<136x4xf32>
    %c0_5 = arith.constant 0 : index
    %c0_6 = arith.constant 0 : index
    %c0_7 = arith.constant 0 : index
    %7 = vector.load %arg4[%c0_5, %c0_6, %c0_7] : memref<7x4x8xf32, #tpu.memory_space<vmem>>, vector<1x4x8xf32>
    %8 = vector.shape_cast %7 : vector<1x4x8xf32> to vector<4x8xf32>
    %cst_8 = arith.constant dense<0.000000e+00> : vector<136x8xf32>
    %9 = tpu.matmul %6, %8, %cst_8 {dimension_numbers = #tpu.dot_dimension_numbers<[1], [0], [0], [1], [0, 0, 1, 1], [], []>} : vector<136x4xf32>, vector<4x8xf32>, vector<136x8xf32> -> vector<136x8xf32>
    %10 = arith.addf %5, %9 : vector<136x8xf32>
    %11 = vector.extract_strided_slice %4 {offsets = [1, 0], sizes = [136, 4], strides = [1, 1]} : vector<256x4xf32> to vector<136x4xf32>
    %c1 = arith.constant 1 : index
    %c0_9 = arith.constant 0 : index
    %c0_10 = arith.constant 0 : index
    %12 = vector.load %arg4[%c1, %c0_9, %c0_10] : memref<7x4x8xf32, #tpu.memory_space<vmem>>, vector<1x4x8xf32>
    %13 = vector.shape_cast %12 : vector<1x4x8xf32> to vector<4x8xf32>
    %cst_11 = arith.constant dense<0.000000e+00> : vector<136x8xf32>
    %14 = tpu.matmul %11, %13, %cst_11 {dimension_numbers = #tpu.dot_dimension_numbers<[1], [0], [0], [1], [0, 0, 1, 1], [], []>} : vector<136x4xf32>, vector<4x8xf32>, vector<136x8xf32> -> vector<136x8xf32>
    %15 = arith.addf %10, %14 : vector<136x8xf32>
    %16 = vector.extract_strided_slice %4 {offsets = [2, 0], sizes = [136, 4], strides = [1, 1]} : vector<256x4xf32> to vector<136x4xf32>
    %c2 = arith.constant 2 : index
    %c0_12 = arith.constant 0 : index
    %c0_13 = arith.constant 0 : index
    %17 = vector.load %arg4[%c2, %c0_12, %c0_13] : memref<7x4x8xf32, #tpu.memory_space<vmem>>, vector<1x4x8xf32>
    %18 = vector.shape_cast %17 : vector<1x4x8xf32> to vector<4x8xf32>
    %cst_14 = arith.constant dense<0.000000e+00> : vector<136x8xf32>
    %19 = tpu.matmul %16, %18, %cst_14 {dimension_numbers = #tpu.dot_dimension_numbers<[1], [0], [0], [1], [0, 0, 1, 1], [], []>} : vector<136x4xf32>, vector<4x8xf32>, vector<136x8xf32> -> vector<136x8xf32>
    %20 = arith.addf %15, %19 : vector<136x8xf32>
    %21 = vector.extract_strided_slice %4 {offsets = [3, 0], sizes = [136, 4], strides = [1, 1]} : vector<256x4xf32> to vector<136x4xf32>
    %c3 = arith.constant 3 : index
    %c0_15 = arith.constant 0 : index
    %c0_16 = arith.constant 0 : index
    %22 = vector.load %arg4[%c3, %c0_15, %c0_16] : memref<7x4x8xf32, #tpu.memory_space<vmem>>, vector<1x4x8xf32>
    %23 = vector.shape_cast %22 : vector<1x4x8xf32> to vector<4x8xf32>
    %cst_17 = arith.constant dense<0.000000e+00> : vector<136x8xf32>
    %24 = tpu.matmul %21, %23, %cst_17 {dimension_numbers = #tpu.dot_dimension_numbers<[1], [0], [0], [1], [0, 0, 1, 1], [], []>} : vector<136x4xf32>, vector<4x8xf32>, vector<136x8xf32> -> vector<136x8xf32>
    %25 = arith.addf %20, %24 : vector<136x8xf32>
    %26 = vector.extract_strided_slice %4 {offsets = [4, 0], sizes = [136, 4], strides = [1, 1]} : vector<256x4xf32> to vector<136x4xf32>
    %c4 = arith.constant 4 : index
    %c0_18 = arith.constant 0 : index
    %c0_19 = arith.constant 0 : index
    %27 = vector.load %arg4[%c4, %c0_18, %c0_19] : memref<7x4x8xf32, #tpu.memory_space<vmem>>, vector<1x4x8xf32>
    %28 = vector.shape_cast %27 : vector<1x4x8xf32> to vector<4x8xf32>
    %cst_20 = arith.constant dense<0.000000e+00> : vector<136x8xf32>
    %29 = tpu.matmul %26, %28, %cst_20 {dimension_numbers = #tpu.dot_dimension_numbers<[1], [0], [0], [1], [0, 0, 1, 1], [], []>} : vector<136x4xf32>, vector<4x8xf32>, vector<136x8xf32> -> vector<136x8xf32>
    %30 = arith.addf %25, %29 : vector<136x8xf32>
    %31 = vector.extract_strided_slice %4 {offsets = [5, 0], sizes = [136, 4], strides = [1, 1]} : vector<256x4xf32> to vector<136x4xf32>
    %c5 = arith.constant 5 : index
    %c0_21 = arith.constant 0 : index
    %c0_22 = arith.constant 0 : index
    %32 = vector.load %arg4[%c5, %c0_21, %c0_22] : memref<7x4x8xf32, #tpu.memory_space<vmem>>, vector<1x4x8xf32>
    %33 = vector.shape_cast %32 : vector<1x4x8xf32> to vector<4x8xf32>
    %cst_23 = arith.constant dense<0.000000e+00> : vector<136x8xf32>
    %34 = tpu.matmul %31, %33, %cst_23 {dimension_numbers = #tpu.dot_dimension_numbers<[1], [0], [0], [1], [0, 0, 1, 1], [], []>} : vector<136x4xf32>, vector<4x8xf32>, vector<136x8xf32> -> vector<136x8xf32>
    %35 = arith.addf %30, %34 : vector<136x8xf32>
    %36 = vector.extract_strided_slice %4 {offsets = [6, 0], sizes = [136, 4], strides = [1, 1]} : vector<256x4xf32> to vector<136x4xf32>
    %c6 = arith.constant 6 : index
    %c0_24 = arith.constant 0 : index
    %c0_25 = arith.constant 0 : index
    %37 = vector.load %arg4[%c6, %c0_24, %c0_25] : memref<7x4x8xf32, #tpu.memory_space<vmem>>, vector<1x4x8xf32>
    %38 = vector.shape_cast %37 : vector<1x4x8xf32> to vector<4x8xf32>
    %cst_26 = arith.constant dense<0.000000e+00> : vector<136x8xf32>
    %39 = tpu.matmul %36, %38, %cst_26 {dimension_numbers = #tpu.dot_dimension_numbers<[1], [0], [0], [1], [0, 0, 1, 1], [], []>} : vector<136x4xf32>, vector<4x8xf32>, vector<136x8xf32> -> vector<136x8xf32>
    %40 = arith.addf %35, %39 : vector<136x8xf32>
    %c0_27 = arith.constant 0 : index
    %c0_28 = arith.constant 0 : index
    %41 = vector.load %arg6[%c0_27, %c0_28] : memref<1x8xf32, #tpu.memory_space<vmem>>, vector<1x8xf32>
    %42 = vector.broadcast %41 : vector<1x8xf32> to vector<136x8xf32>
    %43 = arith.mulf %40, %42 : vector<136x8xf32>
    %c0_29 = arith.constant 0 : index
    %c0_30 = arith.constant 0 : index
    %44 = vector.load %arg7[%c0_29, %c0_30] : memref<1x8xf32, #tpu.memory_space<vmem>>, vector<1x8xf32>
    %45 = vector.broadcast %44 : vector<1x8xf32> to vector<136x8xf32>
    %46 = arith.addf %43, %45 : vector<136x8xf32>
    %cst_31 = arith.constant 0.000000e+00 : f32
    %47 = vector.broadcast %cst_31 : f32 to vector<136x8xf32>
    %48 = arith.maximumf %46, %47 : vector<136x8xf32>
    %49 = tpu.iota {dimensions = array<i32: 0>} : vector<136x8xi32>
    %c128_i32 = arith.constant 128 : i32
    %50 = arith.muli %arg1, %c128_i32 : i32
    %c3_i32 = arith.constant 3 : i32
    %51 = arith.subi %50, %c3_i32 : i32
    %52 = vector.broadcast %51 : i32 to vector<136x8xi32>
    %53 = arith.addi %49, %52 : vector<136x8xi32>
    %c0_i32 = arith.constant 0 : i32
    %54 = vector.broadcast %c0_i32 : i32 to vector<136x8xi32>
    %55 = arith.cmpi sge, %53, %54 : vector<136x8xi32>
    %c16_i32 = arith.constant 16 : i32
    %56 = vector.broadcast %c16_i32 : i32 to vector<136x8xi32>
    %57 = arith.cmpi slt, %53, %56 : vector<136x8xi32>
    %58 = arith.andi %55, %57 : vector<136x8xi1>
    %cst_32 = arith.constant 0.000000e+00 : f32
    %59 = vector.broadcast %cst_32 : f32 to vector<136x8xf32>
    %60 = arith.select %58, %48, %59 : vector<136x8xi1>, vector<136x8xf32>
    %cst_33 = arith.constant 0.000000e+00 : f32
    %61 = vector.broadcast %cst_33 : f32 to vector<128x8xf32>
    %62 = vector.extract_strided_slice %60 {offsets = [0, 0], sizes = [128, 8], strides = [1, 1]} : vector<136x8xf32> to vector<128x8xf32>
    %c0_34 = arith.constant 0 : index
    %c0_35 = arith.constant 0 : index
    %c0_36 = arith.constant 0 : index
    %63 = vector.load %arg5[%c0_34, %c0_35, %c0_36] : memref<7x8x8xf32, #tpu.memory_space<vmem>>, vector<1x8x8xf32>
    %64 = vector.shape_cast %63 : vector<1x8x8xf32> to vector<8x8xf32>
    %cst_37 = arith.constant dense<0.000000e+00> : vector<128x8xf32>
    %65 = tpu.matmul %62, %64, %cst_37 {dimension_numbers = #tpu.dot_dimension_numbers<[1], [0], [0], [1], [0, 0, 1, 1], [], []>} : vector<128x8xf32>, vector<8x8xf32>, vector<128x8xf32> -> vector<128x8xf32>
    %66 = arith.addf %61, %65 : vector<128x8xf32>
    %67 = vector.extract_strided_slice %60 {offsets = [1, 0], sizes = [128, 8], strides = [1, 1]} : vector<136x8xf32> to vector<128x8xf32>
    %c1_38 = arith.constant 1 : index
    %c0_39 = arith.constant 0 : index
    %c0_40 = arith.constant 0 : index
    %68 = vector.load %arg5[%c1_38, %c0_39, %c0_40] : memref<7x8x8xf32, #tpu.memory_space<vmem>>, vector<1x8x8xf32>
    %69 = vector.shape_cast %68 : vector<1x8x8xf32> to vector<8x8xf32>
    %cst_41 = arith.constant dense<0.000000e+00> : vector<128x8xf32>
    %70 = tpu.matmul %67, %69, %cst_41 {dimension_numbers = #tpu.dot_dimension_numbers<[1], [0], [0], [1], [0, 0, 1, 1], [], []>} : vector<128x8xf32>, vector<8x8xf32>, vector<128x8xf32> -> vector<128x8xf32>
    %71 = arith.addf %66, %70 : vector<128x8xf32>
    %72 = vector.extract_strided_slice %60 {offsets = [2, 0], sizes = [128, 8], strides = [1, 1]} : vector<136x8xf32> to vector<128x8xf32>
    %c2_42 = arith.constant 2 : index
    %c0_43 = arith.constant 0 : index
    %c0_44 = arith.constant 0 : index
    %73 = vector.load %arg5[%c2_42, %c0_43, %c0_44] : memref<7x8x8xf32, #tpu.memory_space<vmem>>, vector<1x8x8xf32>
    %74 = vector.shape_cast %73 : vector<1x8x8xf32> to vector<8x8xf32>
    %cst_45 = arith.constant dense<0.000000e+00> : vector<128x8xf32>
    %75 = tpu.matmul %72, %74, %cst_45 {dimension_numbers = #tpu.dot_dimension_numbers<[1], [0], [0], [1], [0, 0, 1, 1], [], []>} : vector<128x8xf32>, vector<8x8xf32>, vector<128x8xf32> -> vector<128x8xf32>
    %76 = arith.addf %71, %75 : vector<128x8xf32>
    %77 = vector.extract_strided_slice %60 {offsets = [3, 0], sizes = [128, 8], strides = [1, 1]} : vector<136x8xf32> to vector<128x8xf32>
    %c3_46 = arith.constant 3 : index
    %c0_47 = arith.constant 0 : index
    %c0_48 = arith.constant 0 : index
    %78 = vector.load %arg5[%c3_46, %c0_47, %c0_48] : memref<7x8x8xf32, #tpu.memory_space<vmem>>, vector<1x8x8xf32>
    %79 = vector.shape_cast %78 : vector<1x8x8xf32> to vector<8x8xf32>
    %cst_49 = arith.constant dense<0.000000e+00> : vector<128x8xf32>
    %80 = tpu.matmul %77, %79, %cst_49 {dimension_numbers = #tpu.dot_dimension_numbers<[1], [0], [0], [1], [0, 0, 1, 1], [], []>} : vector<128x8xf32>, vector<8x8xf32>, vector<128x8xf32> -> vector<128x8xf32>
    %81 = arith.addf %76, %80 : vector<128x8xf32>
    %82 = vector.extract_strided_slice %60 {offsets = [4, 0], sizes = [128, 8], strides = [1, 1]} : vector<136x8xf32> to vector<128x8xf32>
    %c4_50 = arith.constant 4 : index
    %c0_51 = arith.constant 0 : index
    %c0_52 = arith.constant 0 : index
    %83 = vector.load %arg5[%c4_50, %c0_51, %c0_52] : memref<7x8x8xf32, #tpu.memory_space<vmem>>, vector<1x8x8xf32>
    %84 = vector.shape_cast %83 : vector<1x8x8xf32> to vector<8x8xf32>
    %cst_53 = arith.constant dense<0.000000e+00> : vector<128x8xf32>
    %85 = tpu.matmul %82, %84, %cst_53 {dimension_numbers = #tpu.dot_dimension_numbers<[1], [0], [0], [1], [0, 0, 1, 1], [], []>} : vector<128x8xf32>, vector<8x8xf32>, vector<128x8xf32> -> vector<128x8xf32>
    %86 = arith.addf %81, %85 : vector<128x8xf32>
    %87 = vector.extract_strided_slice %60 {offsets = [5, 0], sizes = [128, 8], strides = [1, 1]} : vector<136x8xf32> to vector<128x8xf32>
    %c5_54 = arith.constant 5 : index
    %c0_55 = arith.constant 0 : index
    %c0_56 = arith.constant 0 : index
    %88 = vector.load %arg5[%c5_54, %c0_55, %c0_56] : memref<7x8x8xf32, #tpu.memory_space<vmem>>, vector<1x8x8xf32>
    %89 = vector.shape_cast %88 : vector<1x8x8xf32> to vector<8x8xf32>
    %cst_57 = arith.constant dense<0.000000e+00> : vector<128x8xf32>
    %90 = tpu.matmul %87, %89, %cst_57 {dimension_numbers = #tpu.dot_dimension_numbers<[1], [0], [0], [1], [0, 0, 1, 1], [], []>} : vector<128x8xf32>, vector<8x8xf32>, vector<128x8xf32> -> vector<128x8xf32>
    %91 = arith.addf %86, %90 : vector<128x8xf32>
    %92 = vector.extract_strided_slice %60 {offsets = [6, 0], sizes = [128, 8], strides = [1, 1]} : vector<136x8xf32> to vector<128x8xf32>
    %c6_58 = arith.constant 6 : index
    %c0_59 = arith.constant 0 : index
    %c0_60 = arith.constant 0 : index
    %93 = vector.load %arg5[%c6_58, %c0_59, %c0_60] : memref<7x8x8xf32, #tpu.memory_space<vmem>>, vector<1x8x8xf32>
    %94 = vector.shape_cast %93 : vector<1x8x8xf32> to vector<8x8xf32>
    %cst_61 = arith.constant dense<0.000000e+00> : vector<128x8xf32>
    %95 = tpu.matmul %92, %94, %cst_61 {dimension_numbers = #tpu.dot_dimension_numbers<[1], [0], [0], [1], [0, 0, 1, 1], [], []>} : vector<128x8xf32>, vector<8x8xf32>, vector<128x8xf32> -> vector<128x8xf32>
    %96 = arith.addf %91, %95 : vector<128x8xf32>
    %c0_62 = arith.constant 0 : index
    %c0_63 = arith.constant 0 : index
    %97 = vector.load %arg8[%c0_62, %c0_63] : memref<1x8xf32, #tpu.memory_space<vmem>>, vector<1x8xf32>
    %98 = vector.broadcast %97 : vector<1x8xf32> to vector<128x8xf32>
    %99 = arith.mulf %96, %98 : vector<128x8xf32>
    %c0_64 = arith.constant 0 : index
    %c0_65 = arith.constant 0 : index
    %100 = vector.load %arg9[%c0_64, %c0_65] : memref<1x8xf32, #tpu.memory_space<vmem>>, vector<1x8xf32>
    %101 = vector.broadcast %100 : vector<1x8xf32> to vector<128x8xf32>
    %102 = arith.addf %99, %101 : vector<128x8xf32>
    %cst_66 = arith.constant 0.000000e+00 : f32
    %103 = vector.broadcast %cst_66 : f32 to vector<128x8xf32>
    %104 = arith.maximumf %102, %103 : vector<128x8xf32>
    %105 = tpu.iota {dimensions = array<i32: 0>} : vector<8x8xi32>
    %106 = tpu.iota {dimensions = array<i32: 1>} : vector<8x8xi32>
    %107 = arith.cmpi eq, %105, %106 : vector<8x8xi32>
    %108 = arith.extui %107 : vector<8x8xi1> to vector<8x8xi32>
    %109 = arith.sitofp %108 : vector<8x8xi32> to vector<8x8xf32>
    %cst_67 = arith.constant dense<0.000000e+00> : vector<8x128xf32>
    %110 = tpu.matmul %109, %104, %cst_67 {dimension_numbers = #tpu.dot_dimension_numbers<[1], [1], [0], [0], [0, 0, 1, 0], [], []>} : vector<8x8xf32>, vector<128x8xf32>, vector<8x128xf32> -> vector<8x128xf32>
    %c0_68 = arith.constant 0 : index
    %c0_69 = arith.constant 0 : index
    %c0_70 = arith.constant 0 : index
    %111 = vector.load %arg10[%c0_68, %c0_69, %c0_70] : memref<1x8x128xf32, #tpu.memory_space<vmem>>, vector<1x8x128xf32>
    %112 = vector.shape_cast %111 : vector<1x8x128xf32> to vector<8x128xf32>
    %113 = vector.shape_cast %110 : vector<8x128xf32> to vector<1x8x128xf32>
    tpu.vector_store %arg10[%c0_68, %c0_69, %c0_70], %113 {strides = array<i32>} : memref<1x8x128xf32, #tpu.memory_space<vmem>>, vector<1x8x128xf32>,
    return
  }
  func.func @transform_0(%arg0: i32, %arg1: i32) -> (i32, i32, i32) {
    %c0_i32 = arith.constant 0 : i32
    %c0_i32_0 = arith.constant 0 : i32
    return %arg0, %arg1, %c0_i32 : i32, i32, i32
  }
  func.func @transform_1(%arg0: i32, %arg1: i32) -> (i32, i32, i32) {
    %c1_i32 = arith.constant 1 : i32
    %0 = arith.addi %arg1, %c1_i32 : i32
    %c0_i32 = arith.constant 0 : i32
    %c0_i32_0 = arith.constant 0 : i32
    return %arg0, %0, %c0_i32 : i32, i32, i32
  }
  func.func @transform_2(%arg0: i32, %arg1: i32) -> (i32, i32, i32) {
    %c0_i32 = arith.constant 0 : i32
    %c0_i32_0 = arith.constant 0 : i32
    %c0_i32_1 = arith.constant 0 : i32
    %c0_i32_2 = arith.constant 0 : i32
    return %c0_i32, %c0_i32_0, %c0_i32_1 : i32, i32, i32
  }
  func.func @transform_3(%arg0: i32, %arg1: i32) -> (i32, i32, i32) {
    %c0_i32 = arith.constant 0 : i32
    %c0_i32_0 = arith.constant 0 : i32
    %c0_i32_1 = arith.constant 0 : i32
    %c0_i32_2 = arith.constant 0 : i32
    return %c0_i32, %c0_i32_0, %c0_i32_1 : i32, i32, i32
  }
  func.func @transform_4(%arg0: i32, %arg1: i32) -> (i32, i32) {
    %c0_i32 = arith.constant 0 : i32
    %c0_i32_0 = arith.constant 0 : i32
    %c0_i32_1 = arith.constant 0 : i32
    return %c0_i32, %c0_i32_0 : i32, i32
  }
  func.func @transform_5(%arg0: i32, %arg1: i32) -> (i32, i32) {
    %c0_i32 = arith.constant 0 : i32
    %c0_i32_0 = arith.constant 0 : i32
    %c0_i32_1 = arith.constant 0 : i32
    return %c0_i32, %c0_i32_0 : i32, i32
  }
  func.func @transform_6(%arg0: i32, %arg1: i32) -> (i32, i32) {
    %c0_i32 = arith.constant 0 : i32
    %c0_i32_0 = arith.constant 0 : i32
    %c0_i32_1 = arith.constant 0 : i32
    return %c0_i32, %c0_i32_0 : i32, i32
  }
  func.func @transform_7(%arg0: i32, %arg1: i32) -> (i32, i32) {
    %c0_i32 = arith.constant 0 : i32
    %c0_i32_0 = arith.constant 0 : i32
    %c0_i32_1 = arith.constant 0 : i32
    return %c0_i32, %c0_i32_0 : i32, i32
  }
  func.func @transform_8(%arg0: i32, %arg1: i32) -> (i32, i32, i32) {
    %c0_i32 = arith.constant 0 : i32
    %c0_i32_0 = arith.constant 0 : i32
    return %arg0, %c0_i32, %arg1 : i32, i32, i32
  }
}

</mosaic_0001>

<bundles_post_ra>
// kernel: tpu_custom_call.1
= control target key start
LH: loop header
LB: loop body
LE: loop exit
PB: predicated region body
PF: predicated region fallthrough
CT: control target
= control target key end

     0   :  { %13 = vsyncpa [#allocation3], 0  ;;  %s6693_s0 = inlined_call_operand.vmem [shape: f32[2,256,4], index: 0, kind: input, shape index: {}]   ;;  %s6694_s1 = inlined_call_operand.vmem [shape: f32[2,256,4], index: 1, kind: input, shape index: {}]   ;;  %s6695_s2 = inlined_call_operand.vmem [shape: f32[7,4,8], index: 2, kind: input, shape index: {}]   ;;  %s6696_s3 = inlined_call_operand.vmem [shape: f32[7,8,8], index: 3, kind: input, shape index: {}]   ;;  %s6697_s4 = inlined_call_operand.vmem [shape: f32[1,8], index: 4, kind: input, shape index: {}]   ;;  %s6698_s5 = inlined_call_operand.vmem [shape: f32[1,8], index: 5, kind: input, shape index: {}]   ;;  %s6699_s6 = inlined_call_operand.vmem [shape: f32[1,8], index: 6, kind: input, shape index: {}]   ;;  %s6700_s7 = inlined_call_operand.vmem [shape: f32[1,8], index: 7, kind: input, shape index: {}]   ;;  %s6701_s8 = inlined_call_operand.hbm [shape: f32[2,8,128], index: 8, kind: output, shape index: {}]  }
   0x1   :  { %15 = vsyncpa [#allocation3 + $0x1], 0  ;;  %s5543_s27 = smov 0   ;;  %s5545_s28 = smov 0  }
   0x2   :  { %s5547_s29 = smov 0   ;;  %s5549_s30 = smov 0  }
   0x3   :  { %s5551_s9 = smov 0   ;;  %s5553_s10 = smov 0  }
   0x4 LB: > { %s4052_s11 = sadd.s32 4294967295, %s5492_s10   ;;  %s4053_s12 = sadd.s32 4294967294, %s5492_s10   ;;  %s5492_s10 = sphi %s5553_s10, %s21_s10   ;;  %s5488_s9 = sphi %s5551_s9, %s6710_s9   ;;  %s5484_s30 = sphi %s5549_s30, %s6709_s30   ;;  %s5480_s29 = sphi %s5547_s29, %s6708_s29   ;;  %s5476_s28 = sphi %s5545_s28, %s6707_s28   ;;  %s5472_s27 = sphi %s5543_s27, %s6706_s27  }
   0x5   : > { %s33_s13 = sadd.s32 1, %s5488_s9  ;;  %s226_s14 = sadd.s32 1, %s5480_s29 }
   0x6   : > { %p35_p0 = scmp.ge.s32.totalorder %s33_s13, 2  ;;  %p236_p1 = scmp.ne.s32.totalorder %s5480_s29, %s5476_s28 }
   0x7   : > { %p237_p2 = scmp.eq.s32.totalorder %s4052_s11, 1  ;;  %p242_p3 = scmp.ne.s32.totalorder %s5476_s28, %s5472_s27 }
   0x8   : > { %s6712_s13 = smov (%p35_p0, %s33_s13), 0  ;;  %p243_p5 = scmp.eq.s32.totalorder %s4053_s12, 1 }
   0x9   : > { %p5583_p4 = por %p237_p2, %p236_p1  ;;  %s221_s16 = ssub.s32 %s5488_s9, %s6712_s13 }
   0xa   : > { %p4056_p6 = scmp.ge.s32.totalorder %s5492_s10, 1  ;;  %p224_p7 = scmp.eq.s32.totalorder %s221_s16, 0 }
   0xb   : > { %p5590_p8 = por %p243_p5, %p242_p3  ;;  %p307_p9 = scmp.lt.s32.totalorder %s5492_s10, 3 }
   0xc   : > { %s5596_s18 = scalar_select %p224_p7, %s5480_s29, %s226_s14  }
   0xd   : > { %p308_p10 = pnand %p4056_p6, %p307_p9 }
   0xe   : > { %v5601_v0 = vld [vmem:[%s6695_s2] sm:$0xf] (!%p308_p10)  ;;  %vm487_vm0 = vcmask (!%p308_p10), 1043456   ;;  %p356_p11 = scmp.lt.s32.totalorder (!%p308_p10), %s5484_s30, 1  ;;  %v5494_v1 = vmov (!%p308_p10), 0.0   ;;  %vm5495_vm1 = vmmov (!%p308_p10), 0  }
   0xf   : > { %311 = sbr.rel (%p308_p10) target bundleno = 1261 (0x4ed), region = 52  ;;  %4644 = vmatprep.subr.mxu0 (!%p308_p10), %v5494_v1  ;;  %4646 = vmatprep.mubr.msk.f32.mxu0 (!%p308_p10), %vm5495_vm1, %v5494_v1  ;;  %vm452_vm2 = vcmask (!%p308_p10), 31744   ;;  %v4099_v2 = vld [vmem:[%s6695_s2 + $0x8] sm:$0xf] (!%p308_p10)  ;;  %vm830_vm3 = vcmask (!%p308_p10), 1045504   ;;  %vm1072_vm4 = vcmask (!%p308_p10), 1044480  }
  0x10   : > { %4645 = vmatpush3.msk.msra.mxu0 (!%p308_p10), %vm487_vm0, %v5601_v0  ;;  %4591 = vmatprep.subr.mxu1 (!%p308_p10), %v5494_v1  ;;  %v4118_v14 = vld [vmem:[%s6695_s2 + $0xc] sm:$0xf] (!%p308_p10)  ;;  %v4137_v61 = vld [vmem:[%s6695_s2 + $0x10] sm:$0xf] (!%p308_p10)  ;;  %vm416_vm5 = vcmask (!%p308_p10), 1046528   ;;  %vm1555_vm6 = vcmask (!%p308_p10), 1042432  }
  0x11   : > { %4697 = vmatprep.subr.mxu0 (!%p308_p10), %v5494_v1  ;;  %4593 = vmatprep.mubr.msk.f32.mxu1 (!%p308_p10), %vm5495_vm1, %v5494_v1  ;;  %vm1797_vm7 = vcmask (!%p308_p10), 1041408   ;;  %vm2261_vm9 = vcmask (!%p308_p10), 64512   ;;  %s4322_s24 = sshll.u32 (!%p308_p10), %s5484_s30, 7 }
  0x12   : > { %vm6585_vm11 = vmpackc.low (!%p308_p10), %vm2261_vm9, %vm2261_vm9  ;;  %s6648_s12 = scalar_lea.hbm (!%p308_p10), %s6701_s8, %s4322_s24 }
  0x16   : > { %s5610_s21 = scalar_select %p356_p11, %s5484_s30, 1 }
  0x17   : > { %s5497_s30 = smov [#allocation2]  }
  0x18   : > { %s4325_s22 = sshll.u32 %s5610_s21, 8 }
  0x19   : > { %s5622_s25 = scalar_lea.vmem %s6693_s0, %s4325_s22  ;;  %s4327_s16 = sadd.s32 128, %s4325_s22 }
  0x1a   : > { %v5628_v3 = vld [vmem:[%s5622_s25] sm:$0xff]  ;;  %v5636_v4 = vld [vmem:[%s5622_s25 + $0x8] sm:$0xff]  ;;  %v5644_v5 = vld [vmem:[%s5622_s25 + $0x10] sm:$0xff]  ;;  %s5779_s23 = scalar_lea.vmem %s6694_s1, %s4327_s16  ;;  %s5418_s16 = sshll.u32 %s5497_s30, 4  ;;  %s5419_s16 = int_to_ptr.vmem [resolvable:$false] %s5418_s16 }
  0x1b   : > { %4647 = vmatmul.mubr.msk.f32.vlgmr.msra.gmra.mrb[0].mxu0 %vm452_vm2, %v5628_v3  ;;  %v5651_v6 = vld [vmem:[%s5622_s25 + $0x18] sm:$0xff]  ;;  %v5658_v7 = vld [vmem:[%s5622_s25 + $0x20] sm:$0xff]  ;;  %v5665_v8 = vld [vmem:[%s5622_s25 + $0x28] sm:$0xff]  ;;  %v831_v10 = vrot.slane %v5628_v3, 2  ;;  %v832_v11 = vrot.slane %v5636_v4, 2  ;;  %v834_v13 = vrot.slane %v5644_v5, 2 }
  0x1c   : > { %4698 = vmatpush3.msk.msra.mxu0 %vm487_vm0, %v4099_v2  ;;  %4649 = vmatprep.mubr.msk.f32.mxu0 %vm5495_vm1, %v5494_v1  ;;  %v5672_v9 = vld [vmem:[%s5622_s25 + $0x30] sm:$0xff]  ;;  %v836_v16 = vrot.slane %v5651_v6, 2  ;;  %v838_v18 = vrot.slane %v5658_v7, 2  ;;  %v840_v20 = vrot.slane %v5665_v8, 2  ;;  %v5708_v23 = vld [vmem:[%s5622_s25 + $0x38] sm:$0xff]  ;;  %v5716_v26 = vld [vmem:[%s5622_s25 + $0x40] sm:$0xff] }
  0x1d   : > { %4750 = vmatprep.subr.mxu0 %v5494_v1  ;;  %v833_v12 = vsel %vm830_vm3, %v831_v10, %v832_v11  ;;  %v835_v15 = vsel %vm830_vm3, %v832_v11, %v834_v13  ;;  %v842_v22 = vrot.slane %v5672_v9, 2  ;;  %v844_v25 = vrot.slane %v5708_v23, 2  ;;  %v5724_v29 = vld [vmem:[%s5622_s25 + $0x48] sm:$0xff]  ;;  %v5732_v32 = vld [vmem:[%s5622_s25 + $0x50] sm:$0xff]  ;;  %v5740_v35 = vld [vmem:[%s5622_s25 + $0x58] sm:$0xff]  ;;  %s5420_s19 = scalar_lea.vmem %s5419_s16, 256 }
  0x1e   : > { %v837_v17 = vsel %vm830_vm3, %v834_v13, %v836_v16  ;;  %v839_v19 = vsel %vm830_vm3, %v836_v16, %v838_v18  ;;  %v841_v21 = vsel %vm830_vm3, %v838_v18, %v840_v20  ;;  %v846_v28 = vrot.slane %v5716_v26, 2  ;;  %v5748_v38 = vld [vmem:[%s5622_s25 + $0x60] sm:$0xff]  ;;  %v5756_v41 = vld [vmem:[%s5622_s25 + $0x68] sm:$0xff]  ;;  %v5764_v44 = vld [vmem:[%s5622_s25 + $0x70] sm:$0xff] }
  0x1f   : > { %4650 = vmatmul.mubr.msk.f32.gmra.mrb[2].mxu0 %vm452_vm2, %v5636_v4  ;;  %v843_v24 = vsel %vm830_vm3, %v840_v20, %v842_v22  ;;  %v845_v27 = vsel %vm830_vm3, %v842_v22, %v844_v25  ;;  %v848_v31 = vrot.slane %v5724_v29, 2  ;;  %v850_v34 = vrot.slane %v5732_v32, 2  ;;  %v5774_v47 = vld [vmem:[%s5622_s25 + $0x78] sm:$0xff]  ;;  %v5787_v50 = vld [vmem:[%s5779_s23] sm:$0xff]  ;;  %v5795_v53 = vld [vmem:[%s5779_s23 + $0x8] sm:$0xff] }
  0x20   : > { %4652 = vmatprep.mubr.msk.f32.mxu0 %vm5495_vm1, %v5494_v1  ;;  %v847_v30 = vsel %vm830_vm3, %v844_v25, %v846_v28  ;;  %v852_v37 = vrot.slane %v5740_v35, 2  ;;  %v854_v40 = vrot.slane %v5748_v38, 2  ;;  %v856_v43 = vrot.slane %v5756_v41, 2 }
  0x21   : > { %v849_v33 = vsel %vm830_vm3, %v846_v28, %v848_v31  ;;  %v851_v36 = vsel %vm830_vm3, %v848_v31, %v850_v34  ;;  %v858_v46 = vrot.slane %v5764_v44, 2  ;;  %v860_v49 = vrot.slane %v5774_v47, 2 }
  0x22   : > { %v853_v39 = vsel %vm830_vm3, %v850_v34, %v852_v37  ;;  %v855_v42 = vsel %vm830_vm3, %v852_v37, %v854_v40  ;;  %v857_v45 = vsel %vm830_vm3, %v854_v40, %v856_v43  ;;  %v862_v52 = vrot.slane %v5787_v50, 2 }
  0x23   : > { %4653 = vmatmul.mubr.msk.f32.gmra.mrb[4].mxu0 %vm452_vm2, %v5644_v5  ;;  %v859_v48 = vsel %vm830_vm3, %v856_v43, %v858_v46  ;;  %v861_v51 = vsel %vm830_vm3, %v858_v46, %v860_v49  ;;  %v864_v55 = vrot.slane %v5795_v53, 2  ;;  %v1073_v57 = vrot.slane %v5628_v3, 3 }
  0x24   : > { %4655 = vmatprep.mubr.msk.f32.mxu0 %vm5495_vm1, %v5494_v1  ;;  %v863_v54 = vsel %vm830_vm3, %v860_v49, %v862_v52  ;;  %v1074_v58 = vrot.slane %v5636_v4, 3  ;;  %v1076_v60 = vrot.slane %v5644_v5, 3  ;;  %v1078_v63 = vrot.slane %v5651_v6, 3 }
  0x25   : > { %v865_v56 = vsel %vm830_vm3, %v862_v52, %v864_v55  ;;  %v1080_v10 = vrot.slane %v5658_v7, 3  ;;  %v1086_v16 = vrot.slane %v5708_v23, 3  ;;  %v1088_v18 = vrot.slane %v5716_v26, 3  ;;  %v4156_v52 = vld [vmem:[%s6695_s2 + $0x14] sm:$0xf] }
  0x26   : > { %v1075_v59 = vsel %vm1072_vm4, %v1073_v57, %v1074_v58  ;;  %v1077_v62 = vsel %vm1072_vm4, %v1074_v58, %v1076_v60  ;;  %v1079_v2 = vsel %vm1072_vm4, %v1076_v60, %v1078_v63  ;;  %v1090_v20 = vrot.slane %v5724_v29, 3 }
  0x27   : > { %4656 = vmatmul.mubr.msk.f32.gmra.mrb[6].mxu0 %vm452_vm2, %v5651_v6  ;;  %v1081_v11 = vsel %vm1072_vm4, %v1078_v63, %v1080_v10  ;;  %v1092_v22 = vrot.slane %v5732_v32, 3  ;;  %v1094_v25 = vrot.slane %v5740_v35, 3  ;;  %v1096_v28 = vrot.slane %v5748_v38, 3 }
  0x28   : > { %4658 = vmatprep.mubr.msk.f32.mxu0 %vm5495_vm1, %v5494_v1  ;;  %v1098_v31 = vrot.slane %v5756_v41, 3  ;;  %v1100_v34 = vrot.slane %v5764_v44, 3  ;;  %v1102_v37 = vrot.slane %v5774_v47, 3  ;;  %v1104_v40 = vrot.slane %v5787_v50, 3 }
  0x29   : > { %v1106_v43 = vrot.slane %v5795_v53, 3  ;;  %v1314_v46 = vrot.slane %v5628_v3, 4  ;;  %v1319_v55 = vrot.slane %v5651_v6, 4  ;;  %v417_v57 = vrot.slane %v5628_v3, 1 }
  0x2a   : > { %v418_v58 = vrot.slane %v5636_v4, 1  ;;  %v1321_v60 = vrot.slane %v5658_v7, 4 }
  0x2b   : > { %4659 = vmatmul.mubr.msk.f32.gmra.mrb[8].mxu0 %vm452_vm2, %v5658_v7 }
  0x2c   : > { %4661 = vmatprep.mubr.msk.f32.mxu0 %vm5495_vm1, %v5494_v1  ;;  %v1322_v63 = vsel %vm487_vm0, %v1319_v55, %v1321_v60 }
  0x2f   : > { %4662 = vmatmul.mubr.msk.f32.gmra.mrb[10].mxu0 %vm452_vm2, %v5665_v8 }
  0x30   : > { %4664 = vmatprep.mubr.msk.f32.mxu0 %vm5495_vm1, %v5494_v1 }
  0x33   : > { %4665 = vmatmul.mubr.msk.f32.gmra.mrb[12].mxu0 %vm452_vm2, %v5672_v9 }
  0x34   : > { %4699 = vmatprep.mubr.msk.f32.mxu0 %vm5495_vm1, %v5494_v1 }
  0x37   : > { %4700 = vmatmul.mubr.msk.f32.vlgmr.msra.gmra.mrb[0].mxu0 %vm452_vm2, %v833_v12  ;;  %v1082_v12 = vrot.slane %v5665_v8, 3 }
  0x38   : > { %4751 = vmatpush3.msk.msra.mxu0 %vm487_vm0, %v4118_v14  ;;  %4702 = vmatprep.mubr.msk.f32.mxu0 %vm5495_vm1, %v5494_v1  ;;  %v1084_v14 = vrot.slane %v5672_v9, 3 }
  0x39   : > { %4803 = vmatprep.subr.mxu0 %v5494_v1  ;;  %v1083_v13 = vsel %vm1072_vm4, %v1080_v10, %v1082_v12 }
  0x3b   : > { %4703 = vmatmul.mubr.msk.f32.gmra.mrb[2].mxu0 %vm452_vm2, %v835_v15  ;;  %v1085_v15 = vsel %vm1072_vm4, %v1082_v12, %v1084_v14 }
  0x3c   : > { %4705 = vmatprep.mubr.msk.f32.mxu0 %vm5495_vm1, %v5494_v1 }
  0x3f   : > { %4706 = vmatmul.mubr.msk.f32.gmra.mrb[4].mxu0 %vm452_vm2, %v837_v17  ;;  %v1087_v17 = vsel %vm1072_vm4, %v1084_v14, %v1086_v16 }
  0x40   : > { %4708 = vmatprep.mubr.msk.f32.mxu0 %vm5495_vm1, %v5494_v1 }
  0x43   : > { %4709 = vmatmul.mubr.msk.f32.gmra.mrb[14].mxu0 %vm452_vm2, %v839_v19  ;;  %v1089_v19 = vsel %vm1072_vm4, %v1086_v16, %v1088_v18 }
  0x44   : > { %4711 = vmatprep.mubr.msk.f32.mxu0 %vm5495_vm1, %v5494_v1 }
  0x47   : > { %4712 = vmatmul.mubr.msk.f32.gmra.mrb[16].mxu0 %vm452_vm2, %v841_v21  ;;  %v1091_v21 = vsel %vm1072_vm4, %v1088_v18, %v1090_v20 }
  0x48   : > { %4714 = vmatprep.mubr.msk.f32.mxu0 %vm5495_vm1, %v5494_v1 }
  0x4b   : > { %4715 = vmatmul.mubr.msk.f32.gmra.mrb[18].mxu0 %vm452_vm2, %v843_v24  ;;  %v1093_v24 = vsel %vm1072_vm4, %v1090_v20, %v1092_v22 }
  0x4c   : > { %4717 = vmatprep.mubr.msk.f32.mxu0 %vm5495_vm1, %v5494_v1 }
  0x4f   : > { %4718 = vmatmul.mubr.msk.f32.gmra.mrb[20].mxu0 %vm452_vm2, %v845_v27  ;;  %v1095_v27 = vsel %vm1072_vm4, %v1092_v22, %v1094_v25 }
  0x50   : > { %4720 = vmatprep.mubr.msk.f32.mxu0 %vm5495_vm1, %v5494_v1 }
  0x53   : > { %4721 = vmatmul.mubr.msk.f32.gmra.mrb[22].mxu0 %vm452_vm2, %v847_v30  ;;  %v1097_v30 = vsel %vm1072_vm4, %v1094_v25, %v1096_v28 }
  0x54   : > { %4723 = vmatprep.mubr.msk.f32.mxu0 %vm5495_vm1, %v5494_v1 }
  0x57   : > { %4724 = vmatmul.mubr.msk.f32.gmra.mrb[24].mxu0 %vm452_vm2, %v849_v33  ;;  %v1099_v33 = vsel %vm1072_vm4, %v1096_v28, %v1098_v31 }
  0x58   : > { %4726 = vmatprep.mubr.msk.f32.mxu0 %vm5495_vm1, %v5494_v1 }
  0x5b   : > { %4727 = vmatmul.mubr.msk.f32.gmra.mrb[26].mxu0 %vm452_vm2, %v851_v36  ;;  %v1101_v36 = vsel %vm1072_vm4, %v1098_v31, %v1100_v34 }
  0x5c   : > { %4729 = vmatprep.mubr.msk.f32.mxu0 %vm5495_vm1, %v5494_v1 }
  0x5f   : > { %4730 = vmatmul.mubr.msk.f32.gmra.mrb[28].mxu0 %vm452_vm2, %v853_v39  ;;  %v1103_v39 = vsel %vm1072_vm4, %v1100_v34, %v1102_v37 }
  0x60   : > { %4732 = vmatprep.mubr.msk.f32.mxu0 %vm5495_vm1, %v5494_v1 }
  0x63   : > { %4733 = vmatmul.mubr.msk.f32.gmra.mrb[30].mxu0 %vm452_vm2, %v855_v42  ;;  %v1105_v42 = vsel %vm1072_vm4, %v1102_v37, %v1104_v40 }
  0x64   : > { %4735 = vmatprep.mubr.msk.f32.mxu0 %vm5495_vm1, %v5494_v1 }
  0x67   : > { %4736 = vmatmul.mubr.msk.f32.gmra.mrb[32].mxu0 %vm452_vm2, %v857_v45  ;;  %v1107_v45 = vsel %vm1072_vm4, %v1104_v40, %v1106_v43 }
  0x68   : > { %4738 = vmatprep.mubr.msk.f32.mxu0 %vm5495_vm1, %v5494_v1 }
  0x6b   : > { %4739 = vmatmul.mubr.msk.f32.gmra.mrb[34].mxu0 %vm452_vm2, %v859_v48  ;;  %v1315_v48 = vrot.slane %v5636_v4, 4 }
  0x6c   : > { %4741 = vmatprep.mubr.msk.f32.mxu0 %vm5495_vm1, %v5494_v1 }
  0x6d   : > { %v1316_v49 = vsel %vm487_vm0, %v1314_v46, %v1315_v48 }
  0x6f   : > { %4742 = vmatmul.mubr.msk.f32.gmra.mrb[36].mxu0 %vm452_vm2, %v861_v51  ;;  %v1317_v51 = vrot.slane %v5644_v5, 4 }
  0x70   : > { %4744 = vmatprep.mubr.msk.f32.mxu0 %vm5495_vm1, %v5494_v1 }
  0x73   : > { %4745 = vmatmul.mubr.msk.f32.gmra.mrb[38].mxu0 %vm452_vm2, %v863_v54  ;;  %v1318_v54 = vsel %vm487_vm0, %v1315_v48, %v1317_v51  ;;  %v1556_v48 = vrot.slane %v5628_v3, 5 }
  0x74   : > { %4747 = vmatprep.mubr.msk.f32.mxu0 %vm5495_vm1, %v5494_v1 }
  0x77   : > { %4748 = vmatmul.mubr.msk.f32.gmra.mrb[40].mxu0 %vm452_vm2, %v865_v56  ;;  %v4062_v56 = vld [vmem:[%s6695_s2 + $0x4] sm:$0xf] }
  0x78   : > { %4752 = vmatprep.mubr.msk.f32.mxu0 %vm5495_vm1, %v5494_v1  ;;  %4592 = vmatpush3.msk.msra.mxu1 %vm487_vm0, %v4062_v56  ;;  %v4175_v56 = vld [vmem:[%s6695_s2 + $0x18] sm:$0xf] }
  0x79   : > { %5211 = vmatprep.subr.mxu1 %v5494_v1 }
  0x7b   : > { %4753 = vmatmul.mubr.msk.f32.vlgmr.msra.gmra.mrb[0].mxu0 %vm452_vm2, %v1075_v59  ;;  %v1320_v59 = vsel %vm487_vm0, %v1317_v51, %v1319_v55  ;;  %v1559_v55 = vrot.slane %v5644_v5, 5 }
  0x7c   : > { %4804 = vmatpush3.msk.msra.mxu0 %vm487_vm0, %v4137_v61  ;;  %4755 = vmatprep.mubr.msk.f32.mxu0 %vm5495_vm1, %v5494_v1  ;;  %v419_v61 = vsel %vm416_vm5, %v417_v57, %v418_v58 }
  0x7d   : > { %4856 = vmatprep.subr.mxu0 %v5494_v1  ;;  %4594 = vmatmul.mubr.msk.f32.vlgmr.msra.gmra.mrb[0].mxu1 %vm452_vm2, %v419_v61 }
  0x7e   : > { %4596 = vmatprep.mubr.msk.f32.mxu1 %vm5495_vm1, %v5494_v1  ;;  %5212 = vmatpush3.msk.msra.mxu1 %vm487_vm0, %v5601_v0 }
  0x7f   : > { %4756 = vmatmul.mubr.msk.f32.gmra.mrb[2].mxu0 %vm452_vm2, %v1077_v62  ;;  %v420_v62 = vrot.slane %v5644_v5, 1 }
  0x80   : > { %4758 = vmatprep.mubr.msk.f32.mxu0 %vm5495_vm1, %v5494_v1 }
  0x81   : > { %v421_v10 = vsel %vm416_vm5, %v418_v58, %v420_v62 }
  0x82   : > { %4597 = vmatmul.mubr.msk.f32.gmra.mrb[2].mxu1 %vm452_vm2, %v421_v10 }
  0x83   : > { %4759 = vmatmul.mubr.msk.f32.gmra.mrb[4].mxu0 %vm452_vm2, %v1079_v2  ;;  %v1323_v2 = vrot.slane %v5665_v8, 4  ;;  %4599 = vmatprep.mubr.msk.f32.mxu1 %vm5495_vm1, %v5494_v1 }
  0x84   : > { %4761 = vmatprep.mubr.msk.f32.mxu0 %vm5495_vm1, %v5494_v1 }
  0x85   : > { %v1324_v12 = vsel %vm487_vm0, %v1321_v60, %v1323_v2  ;;  %v1561_v60 = vrot.slane %v5651_v6, 5 }
  0x87   : > { %4762 = vmatmul.mubr.msk.f32.gmra.mrb[42].mxu0 %vm452_vm2, %v1081_v11  ;;  %v422_v11 = vrot.slane %v5651_v6, 1 }
  0x88   : > { %4764 = vmatprep.mubr.msk.f32.mxu0 %vm5495_vm1, %v5494_v1 }
  0x89   : > { %v423_v0 = vsel %vm416_vm5, %v420_v62, %v422_v11 }
  0x8a   : > { %4600 = vmatmul.mubr.msk.f32.gmra.mrb[4].mxu1 %vm452_vm2, %v423_v0  ;;  %v1567_v0 = vrot.slane %v5672_v9, 5 }
  0x8b   : > { %4765 = vmatmul.mubr.msk.f32.gmra.mrb[44].mxu0 %vm452_vm2, %v1083_v13  ;;  %v1325_v13 = vrot.slane %v5672_v9, 4  ;;  %4602 = vmatprep.mubr.msk.f32.mxu1 %vm5495_vm1, %v5494_v1 }
  0x8c   : > { %4767 = vmatprep.mubr.msk.f32.mxu0 %vm5495_vm1, %v5494_v1 }
  0x8d   : > { %v1326_v14 = vsel %vm487_vm0, %v1323_v2, %v1325_v13  ;;  %v1563_v2 = vrot.slane %v5658_v7, 5 }
  0x8f   : > { %4768 = vmatmul.mubr.msk.f32.gmra.mrb[46].mxu0 %vm452_vm2, %v1085_v15  ;;  %v1327_v15 = vrot.slane %v5708_v23, 4  ;;  %v1564_v10 = vsel %vm1555_vm6, %v1561_v60, %v1563_v2 }
  0x90   : > { %4770 = vmatprep.mubr.msk.f32.mxu0 %vm5495_vm1, %v5494_v1 }
  0x91   : > { %v1328_v16 = vsel %vm487_vm0, %v1325_v13, %v1327_v15 }
  0x93   : > { %4771 = vmatmul.mubr.msk.f32.gmra.mrb[48].mxu0 %vm452_vm2, %v1087_v17  ;;  %v1329_v17 = vrot.slane %v5716_v26, 4 }
  0x94   : > { %4773 = vmatprep.mubr.msk.f32.mxu0 %vm5495_vm1, %v5494_v1 }
  0x95   : > { %v1330_v18 = vsel %vm487_vm0, %v1327_v15, %v1329_v17  ;;  %v1569_v15 = vrot.slane %v5708_v23, 5 }
  0x97   : > { %4774 = vmatmul.mubr.msk.f32.gmra.mrb[50].mxu0 %vm452_vm2, %v1089_v19  ;;  %v1331_v19 = vrot.slane %v5724_v29, 4 }
  0x98   : > { %4776 = vmatprep.mubr.msk.f32.mxu0 %vm5495_vm1, %v5494_v1 }
  0x99   : > { %v1332_v20 = vsel %vm487_vm0, %v1329_v17, %v1331_v19 }
  0x9b   : > { %4777 = vmatmul.mubr.msk.f32.gmra.mrb[52].mxu0 %vm452_vm2, %v1091_v21  ;;  %v1333_v21 = vrot.slane %v5732_v32, 4 }
  0x9c   : > { %4779 = vmatprep.mubr.msk.f32.mxu0 %vm5495_vm1, %v5494_v1 }
  0x9d   : > { %v1334_v22 = vsel %vm487_vm0, %v1331_v19, %v1333_v21  ;;  %v1571_v19 = vrot.slane %v5716_v26, 5 }
  0x9f   : > { %4780 = vmatmul.mubr.msk.f32.gmra.mrb[54].mxu0 %vm452_vm2, %v1093_v24  ;;  %v1335_v24 = vrot.slane %v5740_v35, 4 }
  0xa0   : > { %4782 = vmatprep.mubr.msk.f32.mxu0 %vm5495_vm1, %v5494_v1 }
  0xa1   : > { %v1336_v25 = vsel %vm487_vm0, %v1333_v21, %v1335_v24 }
  0xa3   : > { %4783 = vmatmul.mubr.msk.f32.gmra.mrb[56].mxu0 %vm452_vm2, %v1095_v27  ;;  %v1337_v27 = vrot.slane %v5748_v38, 4 }
  0xa4   : > { %4785 = vmatprep.mubr.msk.f32.mxu0 %vm5495_vm1, %v5494_v1 }
  0xa5   : > { %v1338_v28 = vsel %vm487_vm0, %v1335_v24, %v1337_v27  ;;  %v1573_v24 = vrot.slane %v5724_v29, 5 }
  0xa7   : > { %4786 = vmatmul.mubr.msk.f32.gmra.mrb[58].mxu0 %vm452_vm2, %v1097_v30  ;;  %v1339_v30 = vrot.slane %v5756_v41, 4 }
  0xa8   : > { %4788 = vmatprep.mubr.msk.f32.mxu0 %vm5495_vm1, %v5494_v1 }
  0xa9   : > { %v1340_v31 = vsel %vm487_vm0, %v1337_v27, %v1339_v30 }
  0xab   : > { %4789 = vmatmul.mubr.msk.f32.gmra.mrb[60].mxu0 %vm452_vm2, %v1099_v33  ;;  %v1341_v33 = vrot.slane %v5764_v44, 4 }
  0xac   : > { %4791 = vmatprep.mubr.msk.f32.mxu0 %vm5495_vm1, %v5494_v1 }
  0xad   : > { %v1342_v34 = vsel %vm487_vm0, %v1339_v30, %v1341_v33  ;;  %v1575_v30 = vrot.slane %v5732_v32, 5 }
  0xaf   : > { %4792 = vmatmul.mubr.msk.f32.gmra.mrb[62].mxu0 %vm452_vm2, %v1101_v36  ;;  %v1343_v36 = vrot.slane %v5774_v47, 4 }
  0xb0   : > { %4794 = vmatprep.mubr.msk.f32.mxu0 %vm5495_vm1, %v5494_v1 }
  0xb1   : > { %v1344_v37 = vsel %vm487_vm0, %v1341_v33, %v1343_v36 }
  0xb3   : > { %4795 = vmatmul.mubr.msk.f32.gmra.mrb[64].mxu0 %vm452_vm2, %v1103_v39  ;;  %v1345_v39 = vrot.slane %v5787_v50, 4 }
  0xb4   : > { %4797 = vmatprep.mubr.msk.f32.mxu0 %vm5495_vm1, %v5494_v1 }
  0xb5   : > { %v1346_v40 = vsel %vm487_vm0, %v1343_v36, %v1345_v39  ;;  %v1577_v36 = vrot.slane %v5740_v35, 5 }
  0xb7   : > { %4798 = vmatmul.mubr.msk.f32.gmra.mrb[66].mxu0 %vm452_vm2, %v1105_v42  ;;  %v1347_v42 = vrot.slane %v5795_v53, 4 }
  0xb8   : > { %4800 = vmatprep.mubr.msk.f32.mxu0 %vm5495_vm1, %v5494_v1 }
  0xb9   : > { %v1348_v46 = vsel %vm487_vm0, %v1345_v39, %v1347_v42  ;;  %v1579_v42 = vrot.slane %v5748_v38, 5 }
  0xbb   : > { %4801 = vmatmul.mubr.msk.f32.gmra.mrb[68].mxu0 %vm452_vm2, %v1107_v45 }
  0xbc   : > { %4805 = vmatprep.mubr.msk.f32.mxu0 %vm5495_vm1, %v5494_v1 }
  0xbf   : > { %4806 = vmatmul.mubr.msk.f32.vlgmr.msra.gmra.mrb[0].mxu0 %vm452_vm2, %v1316_v49  ;;  %v1557_v49 = vrot.slane %v5636_v4, 5 }
  0xc0   : > { %4857 = vmatpush3.msk.msra.mxu0 %vm487_vm0, %v4156_v52  ;;  %4808 = vmatprep.mubr.msk.f32.mxu0 %vm5495_vm1, %v5494_v1 }
  0xc1   : > { %4909 = vmatprep.subr.mxu0 %v5494_v1 }
  0xc3   : > { %4809 = vmatmul.mubr.msk.f32.gmra.mrb[2].mxu0 %vm452_vm2, %v1318_v54  ;;  %v1558_v54 = vsel %vm1555_vm6, %v1556_v48, %v1557_v49  ;;  %v1581_v48 = vrot.slane %v5756_v41, 5 }
  0xc4   : > { %4811 = vmatprep.mubr.msk.f32.mxu0 %vm5495_vm1, %v5494_v1 }
  0xc7   : > { %4812 = vmatmul.mubr.msk.f32.gmra.mrb[4].mxu0 %vm452_vm2, %v1320_v59  ;;  %v1560_v59 = vsel %vm1555_vm6, %v1557_v49, %v1559_v55 }
  0xc8   : > { %4814 = vmatprep.mubr.msk.f32.mxu0 %vm5495_vm1, %v5494_v1 }
  0xcb   : > { %4815 = vmatmul.mubr.msk.f32.gmra.mrb[70].mxu0 %vm452_vm2, %v1322_v63  ;;  %v1562_v63 = vsel %vm1555_vm6, %v1559_v55, %v1561_v60 }
  0xcc   : > { %4817 = vmatprep.mubr.msk.f32.mxu0 %vm5495_vm1, %v5494_v1 }
  0xcf   : > { %4818 = vmatmul.mubr.msk.f32.gmra.mrb[72].mxu0 %vm452_vm2, %v1324_v12  ;;  %v1565_v12 = vrot.slane %v5665_v8, 5 }
  0xd0   : > { %4820 = vmatprep.mubr.msk.f32.mxu0 %vm5495_vm1, %v5494_v1 }
  0xd1   : > { %v1566_v13 = vsel %vm1555_vm6, %v1563_v2, %v1565_v12 }
  0xd3   : > { %4821 = vmatmul.mubr.msk.f32.gmra.mrb[74].mxu0 %vm452_vm2, %v1326_v14  ;;  %v1568_v14 = vsel %vm1555_vm6, %v1565_v12, %v1567_v0  ;;  %v1589_v12 = vrot.slane %v5795_v53, 5 }
  0xd4   : > { %4823 = vmatprep.mubr.msk.f32.mxu0 %vm5495_vm1, %v5494_v1 }
  0xd7   : > { %4824 = vmatmul.mubr.msk.f32.gmra.mrb[76].mxu0 %vm452_vm2, %v1328_v16 }
  0xd8   : > { %4826 = vmatprep.mubr.msk.f32.mxu0 %vm5495_vm1, %v5494_v1 }
  0xdb   : > { %4827 = vmatmul.mubr.msk.f32.gmra.mrb[78].mxu0 %vm452_vm2, %v1330_v18  ;;  %v1570_v18 = vsel %vm1555_vm6, %v1567_v0, %v1569_v15 }
  0xdc   : > { %4829 = vmatprep.mubr.msk.f32.mxu0 %vm5495_vm1, %v5494_v1 }
  0xdf   : > { %4830 = vmatmul.mubr.msk.f32.gmra.mrb[80].mxu0 %vm452_vm2, %v1332_v20 }
  0xe0   : > { %4832 = vmatprep.mubr.msk.f32.mxu0 %vm5495_vm1, %v5494_v1 }
  0xe3   : > { %4833 = vmatmul.mubr.msk.f32.gmra.mrb[82].mxu0 %vm452_vm2, %v1334_v22  ;;  %v1572_v22 = vsel %vm1555_vm6, %v1569_v15, %v1571_v19  ;;  %v1798_v15 = vrot.slane %v5628_v3, 6 }
  0xe4   : > { %4835 = vmatprep.mubr.msk.f32.mxu0 %vm5495_vm1, %v5494_v1 }
  0xe7   : > { %4836 = vmatmul.mubr.msk.f32.gmra.mrb[84].mxu0 %vm452_vm2, %v1336_v25 }
  0xe8   : > { %4838 = vmatprep.mubr.msk.f32.mxu0 %vm5495_vm1, %v5494_v1 }
  0xeb   : > { %4839 = vmatmul.mubr.msk.f32.gmra.mrb[86].mxu0 %vm452_vm2, %v1338_v28  ;;  %v1574_v28 = vsel %vm1555_vm6, %v1571_v19, %v1573_v24 }
  0xec   : > { %4841 = vmatprep.mubr.msk.f32.mxu0 %vm5495_vm1, %v5494_v1 }
  0xef   : > { %4842 = vmatmul.mubr.msk.f32.gmra.mrb[88].mxu0 %vm452_vm2, %v1340_v31 }
  0xf0   : > { %4844 = vmatprep.mubr.msk.f32.mxu0 %vm5495_vm1, %v5494_v1 }
  0xf3   : > { %4845 = vmatmul.mubr.msk.f32.gmra.mrb[90].mxu0 %vm452_vm2, %v1342_v34  ;;  %v1576_v34 = vsel %vm1555_vm6, %v1573_v24, %v1575_v30 }
  0xf4   : > { %4847 = vmatprep.mubr.msk.f32.mxu0 %vm5495_vm1, %v5494_v1 }
  0xf7   : > { %4848 = vmatmul.mubr.msk.f32.gmra.mrb[92].mxu0 %vm452_vm2, %v1344_v37 }
  0xf8   : > { %4850 = vmatprep.mubr.msk.f32.mxu0 %vm5495_vm1, %v5494_v1 }
  0xfa   : > { %v759_v43 = vpop.f32.mrb[6].mxu0 }
  0xfb   : > { %v4657_v45 = vpop.f32.mrb[7].mxu0  ;;  %4851 = vmatmul.mubr.msk.f32.gmra.mrb[94].mxu0 %vm452_vm2, %v1346_v40  ;;  %v1578_v40 = vsel %vm1555_vm6, %v1575_v30, %v1577_v36 }
  0xfc   : > { %4853 = vmatprep.mubr.msk.f32.mxu0 %vm5495_vm1, %v5494_v1 }
  0xfe   : > { %v764_v51 = vpop.f32.mrb[8].mxu0 }
  0xff   : > { %v4660_v52 = vpop.f32.mrb[9].mxu0  ;;  %4854 = vmatmul.mubr.msk.f32.gmra.mrb[96].mxu0 %vm452_vm2, %v1348_v46  ;;  %v1580_v46 = vsel %vm1555_vm6, %v1577_v36, %v1579_v42 }
 0x100   : > { %4858 = vmatprep.mubr.msk.f32.mxu0 %vm5495_vm1, %v5494_v1  ;;  %v1582_v52 = vsel %vm1555_vm6, %v1579_v42, %v1581_v48 }
 0x102   : > { %v769_v57 = vpop.f32.mrb[10].mxu0 }
 0x103   : > { %v4663_v58 = vpop.f32.mrb[11].mxu0  ;;  %4859 = vmatmul.mubr.msk.f32.vlgmr.msra.gmra.mrb[0].mxu0 %vm452_vm2, %v1558_v54  ;;  %v1583_v54 = vrot.slane %v5764_v44, 5 }
 0x104   : > { %4910 = vmatpush3.msk.msra.mxu0 %vm487_vm0, %v4175_v56  ;;  %4861 = vmatprep.mubr.msk.f32.mxu0 %vm5495_vm1, %v5494_v1  ;;  %v1585_v58 = vrot.slane %v5774_v47, 5 }
 0x105   : > { %v1584_v57 = vsel %vm1555_vm6, %v1581_v48, %v1583_v54 }
 0x106   : > { %v774_v61 = vpop.f32.mrb[12].mxu0 }
 0x107   : > { %v4666_v62 = vpop.f32.mrb[13].mxu0  ;;  %4862 = vmatmul.mubr.msk.f32.gmra.mrb[2].mxu0 %vm452_vm2, %v1560_v59  ;;  %v1586_v61 = vsel %vm1555_vm6, %v1583_v54, %v1585_v58 }
 0x108   : > { %4864 = vmatprep.mubr.msk.f32.mxu0 %vm5495_vm1, %v5494_v1  ;;  %v1587_v62 = vrot.slane %v5787_v50, 5 }
 0x10b   : > { %4865 = vmatmul.mubr.msk.f32.gmra.mrb[4].mxu0 %vm452_vm2, %v1562_v63 }
 0x10c   : > { %4867 = vmatprep.mubr.msk.f32.mxu0 %vm5495_vm1, %v5494_v1 }
 0x10f   : > { %4868 = vmatmul.mubr.msk.f32.gmra.mrb[98].mxu0 %vm452_vm2, %v1564_v10  ;;  %v1588_v10 = vsel %vm1555_vm6, %v1585_v58, %v1587_v62 }
 0x110   : > { %4870 = vmatprep.mubr.msk.f32.mxu0 %vm5495_vm1, %v5494_v1 }
 0x113   : > { %4871 = vmatmul.mubr.msk.f32.gmra.mrb[100].mxu0 %vm452_vm2, %v1566_v13 }
 0x114   : > { %4873 = vmatprep.mubr.msk.f32.mxu0 %vm5495_vm1, %v5494_v1 }
 0x116   : > { %v984_v16 = vpop.f32.mrb[14].mxu0 }
 0x117   : > { %v4710_v17 = vpop.f32.mrb[15].mxu0  ;;  %4874 = vmatmul.mubr.msk.f32.gmra.mrb[102].mxu0 %vm452_vm2, %v1568_v14  ;;  %v1590_v14 = vsel %vm1555_vm6, %v1587_v62, %v1589_v12  ;;  %v1799_v16 = vrot.slane %v5636_v4, 6  ;;  %v1803_v4 = vrot.slane %v5651_v6, 6 }
 0x118   : > { %4876 = vmatprep.mubr.msk.f32.mxu0 %vm5495_vm1, %v5494_v1 }
 0x119   : > { %v1800_v19 = vsel %vm1797_vm7, %v1798_v15, %v1799_v16 }
 0x11a   : > { %v989_v20 = vpop.f32.mrb[16].mxu0 }
 0x11b   : > { %v4713_v21 = vpop.f32.mrb[17].mxu0  ;;  %4877 = vmatmul.mubr.msk.f32.gmra.mrb[104].mxu0 %vm452_vm2, %v1570_v18  ;;  %v1801_v20 = vrot.slane %v5644_v5, 6 }
 0x11c   : > { %4879 = vmatprep.mubr.msk.f32.mxu0 %vm5495_vm1, %v5494_v1 }
 0x11d   : > { %v1802_v3 = vsel %vm1797_vm7, %v1799_v16, %v1801_v20  ;;  %v1804_v5 = vsel %vm1797_vm7, %v1801_v20, %v1803_v4 }
 0x11e   : > { %v994_v25 = vpop.f32.mrb[18].mxu0 }
 0x11f   : > { %v4716_v27 = vpop.f32.mrb[19].mxu0  ;;  %4880 = vmatmul.mubr.msk.f32.gmra.mrb[106].mxu0 %vm452_vm2, %v1572_v22  ;;  %v424_v25 = vrot.slane %v5658_v7, 1  ;;  %v426_v7 = vrot.slane %v5665_v8, 1 }
 0x120   : > { %4882 = vmatprep.mubr.msk.f32.mxu0 %vm5495_vm1, %v5494_v1 }
 0x121   : > { %v427_v30 = vsel %vm416_vm5, %v424_v25, %v426_v7 }
 0x122   : > { %v999_v31 = vpop.f32.mrb[20].mxu0 }
 0x123   : > { %v4719_v33 = vpop.f32.mrb[21].mxu0  ;;  %4883 = vmatmul.mubr.msk.f32.gmra.mrb[108].mxu0 %vm452_vm2, %v1574_v28  ;;  %v425_v28 = vsel %vm416_vm5, %v422_v11, %v424_v25  ;;  %v428_v11 = vrot.slane %v5672_v9, 1  ;;  %v430_v31 = vrot.slane %v5708_v23, 1 }
 0x124   : > { %4885 = vmatprep.mubr.msk.f32.mxu0 %vm5495_vm1, %v5494_v1  ;;  %4603 = vmatmul.mubr.msk.f32.gmra.mrb[6].mxu1 %vm452_vm2, %v425_v28  ;;  %v4196_v28 = vld [vmem:[%s6696_s3 + $0x8] sm:$0xff] }
 0x125   : > { %4605 = vmatprep.mubr.msk.f32.mxu1 %vm5495_vm1, %v5494_v1  ;;  %v429_v33 = vsel %vm416_vm5, %v426_v7, %v428_v11  ;;  %v431_v8 = vsel %vm416_vm5, %v428_v11, %v430_v31  ;;  %4962 = vmatprep.subr.mxu1 %v4196_v28 }
 0x126   : > { %v1004_v37 = vpop.f32.mrb[22].mxu0 }
 0x127   : > { %v4722_v39 = vpop.f32.mrb[23].mxu0  ;;  %4886 = vmatmul.mubr.msk.f32.gmra.mrb[110].mxu0 %vm452_vm2, %v1576_v34  ;;  %v432_v34 = vrot.slane %v5716_v26, 1  ;;  %v434_v37 = vrot.slane %v5724_v29, 1 }
 0x128   : > { %4888 = vmatprep.mubr.msk.f32.mxu0 %vm5495_vm1, %v5494_v1  ;;  %4606 = vmatmul.mubr.msk.f32.gmra.mrb[8].mxu1 %vm452_vm2, %v427_v30 }
 0x129   : > { %4608 = vmatprep.mubr.msk.f32.mxu1 %vm5495_vm1, %v5494_v1  ;;  %v433_v9 = vsel %vm416_vm5, %v430_v31, %v432_v34  ;;  %v435_v42 = vsel %vm416_vm5, %v432_v34, %v434_v37 }
 0x12a   : > { %v1009_v43 = vpop.f32.mrb[24].mxu0 }
 0x12b   : > { %v4725_v45 = vpop.f32.mrb[25].mxu0  ;;  %4889 = vmatmul.mubr.msk.f32.gmra.mrb[112].mxu0 %vm452_vm2, %v1578_v40 }
 0x12c   : > { %4891 = vmatprep.mubr.msk.f32.mxu0 %vm5495_vm1, %v5494_v1  ;;  %4609 = vmatmul.mubr.msk.f32.gmra.mrb[10].mxu1 %vm452_vm2, %v429_v33 }
 0x12d   : > { %4611 = vmatprep.mubr.msk.f32.mxu1 %vm5495_vm1, %v5494_v1 }
 0x12e   : > { %v1014_v49 = vpop.f32.mrb[26].mxu0 }
 0x12f   : > { %v4728_v51 = vpop.f32.mrb[27].mxu0  ;;  %4892 = vmatmul.mubr.msk.f32.gmra.mrb[114].mxu0 %vm452_vm2, %v1580_v46  ;;  %v436_v46 = vrot.slane %v5732_v32, 1 }
 0x130   : > { %4894 = vmatprep.mubr.msk.f32.mxu0 %vm5495_vm1, %v5494_v1  ;;  %4612 = vmatmul.mubr.msk.f32.gmra.mrb[12].mxu1 %vm452_vm2, %v431_v8 }
 0x131   : > { %4614 = vmatprep.mubr.msk.f32.mxu1 %vm5495_vm1, %v5494_v1  ;;  %v437_v49 = vsel %vm416_vm5, %v434_v37, %v436_v46 }
 0x132   : > { %v1019_v55 = vpop.f32.mrb[28].mxu0 }
 0x133   : > { %v4731_v56 = vpop.f32.mrb[29].mxu0  ;;  %4895 = vmatmul.mubr.msk.f32.gmra.mrb[116].mxu0 %vm452_vm2, %v1582_v52  ;;  %v438_v52 = vrot.slane %v5740_v35, 1 }
 0x134   : > { %4897 = vmatprep.mubr.msk.f32.mxu0 %vm5495_vm1, %v5494_v1  ;;  %4615 = vmatmul.mubr.msk.f32.gmra.mrb[14].mxu1 %vm452_vm2, %v433_v9 }
 0x135   : > { %4617 = vmatprep.mubr.msk.f32.mxu1 %vm5495_vm1, %v5494_v1  ;;  %v439_v55 = vsel %vm416_vm5, %v436_v46, %v438_v52 }
 0x136   : > { %v1024_v59 = vpop.f32.mrb[30].mxu0 }
 0x137   : > { %v4734_v60 = vpop.f32.mrb[31].mxu0  ;;  %4898 = vmatmul.mubr.msk.f32.gmra.mrb[118].mxu0 %vm452_vm2, %v1584_v57  ;;  %v440_v57 = vrot.slane %v5748_v38, 1 }
 0x138   : > { %4900 = vmatprep.mubr.msk.f32.mxu0 %vm5495_vm1, %v5494_v1  ;;  %4618 = vmatmul.mubr.msk.f32.gmra.mrb[16].mxu1 %vm452_vm2, %v435_v42 }
 0x139   : > { %4620 = vmatprep.mubr.msk.f32.mxu1 %vm5495_vm1, %v5494_v1  ;;  %v441_v59 = vsel %vm416_vm5, %v438_v52, %v440_v57 }
 0x13a   : > { %v1029_v63 = vpop.f32.mrb[32].mxu0 }
 0x13b   : > { %v4737_v2 = vpop.f32.mrb[33].mxu0  ;;  %4901 = vmatmul.mubr.msk.f32.gmra.mrb[120].mxu0 %vm452_vm2, %v1586_v61  ;;  %v442_v61 = vrot.slane %v5756_v41, 1 }
 0x13c   : > { %4903 = vmatprep.mubr.msk.f32.mxu0 %vm5495_vm1, %v5494_v1  ;;  %4621 = vmatmul.mubr.msk.f32.gmra.mrb[18].mxu1 %vm452_vm2, %v437_v49 }
 0x13d   : > { %4623 = vmatprep.mubr.msk.f32.mxu1 %vm5495_vm1, %v5494_v1  ;;  %v443_v63 = vsel %vm416_vm5, %v440_v57, %v442_v61 }
 0x13e   : > { %v1034_v13 = vpop.f32.mrb[34].mxu0 }
 0x13f   : > { %v4740_v0 = vpop.f32.mrb[35].mxu0  ;;  %4904 = vmatmul.mubr.msk.f32.gmra.mrb[122].mxu0 %vm452_vm2, %v1588_v10  ;;  %v444_v10 = vrot.slane %v5764_v44, 1 }
 0x140   : > { %4906 = vmatprep.mubr.msk.f32.mxu0 %vm5495_vm1, %v5494_v1  ;;  %4624 = vmatmul.mubr.msk.f32.gmra.mrb[20].mxu1 %vm452_vm2, %v439_v55 }
 0x141   : > { %4626 = vmatprep.mubr.msk.f32.mxu1 %vm5495_vm1, %v5494_v1  ;;  %v445_v13 = vsel %vm416_vm5, %v442_v61, %v444_v10 }
 0x142   : > { %v1039_v17 = vpop.f32.mrb[36].mxu0 }
 0x143   : > { %v4743_v18 = vpop.f32.mrb[37].mxu0  ;;  %4907 = vmatmul.mubr.msk.f32.gmra.mrb[124].mxu0 %vm452_vm2, %v1590_v14  ;;  %v446_v14 = vrot.slane %v5774_v47, 1 }
 0x144   : > { %4911 = vmatprep.mubr.msk.f32.mxu0 %vm5495_vm1, %v5494_v1  ;;  %4627 = vmatmul.mubr.msk.f32.gmra.mrb[22].mxu1 %vm452_vm2, %v441_v59  ;;  %v448_v18 = vrot.slane %v5787_v50, 1 }
 0x145   : > { %4629 = vmatprep.mubr.msk.f32.mxu1 %vm5495_vm1, %v5494_v1  ;;  %v447_v16 = vsel %vm416_vm5, %v444_v10, %v446_v14 }
 0x146   : > { %v1044_v21 = vpop.f32.mrb[38].mxu0  ;;  %v449_v20 = vsel %vm416_vm5, %v446_v14, %v448_v18 }
 0x147   : > { %v4746_v22 = vpop.f32.mrb[39].mxu0  ;;  %4912 = vmatmul.mubr.msk.f32.vlgmr.msra.gmra.mrb[0].mxu0 %vm452_vm2, %v1800_v19 }
 0x148   : > { %4914 = vmatprep.mubr.msk.f32.mxu0 %vm5495_vm1, %v5494_v1  ;;  %4630 = vmatmul.mubr.msk.f32.gmra.mrb[24].mxu1 %vm452_vm2, %v443_v63  ;;  %v450_v22 = vrot.slane %v5795_v53, 1 }
 0x149   : > { %4632 = vmatprep.mubr.msk.f32.mxu1 %vm5495_vm1, %v5494_v1 }
 0x14a   : > { %v1049_v24 = vpop.f32.mrb[40].mxu0 }
 0x14b   : > { %v4749_v27 = vpop.f32.mrb[41].mxu0  ;;  %4915 = vmatmul.mubr.msk.f32.gmra.mrb[2].mxu0 %vm452_vm2, %v1802_v3  ;;  %v451_v24 = vsel %vm416_vm5, %v448_v18, %v450_v22 }
 0x14c   : > { %4917 = vmatprep.mubr.msk.f32.mxu0 %vm5495_vm1, %v5494_v1  ;;  %4633 = vmatmul.mubr.msk.f32.gmra.mrb[26].mxu1 %vm452_vm2, %v445_v13 }
 0x14d   : > { %4635 = vmatprep.mubr.msk.f32.mxu1 %vm5495_vm1, %v5494_v1 }
 0x14f   : > { %4918 = vmatmul.mubr.msk.f32.gmra.mrb[4].mxu0 %vm452_vm2, %v1804_v5 }
 0x150   : > { %4920 = vmatprep.mubr.msk.f32.mxu0 %vm5495_vm1, %v5494_v1  ;;  %4636 = vmatmul.mubr.msk.f32.gmra.mrb[28].mxu1 %vm452_vm2, %v447_v16 }
 0x151   : > { %4638 = vmatprep.mubr.msk.f32.mxu1 %vm5495_vm1, %v5494_v1 }
 0x154   : > { %4639 = vmatmul.mubr.msk.f32.gmra.mrb[30].mxu1 %vm452_vm2, %v449_v20 }
 0x155   : > { %4641 = vmatprep.mubr.msk.f32.mxu1 %vm5495_vm1, %v5494_v1 }
 0x158   : > { %4642 = vmatmul.mubr.msk.f32.gmra.mrb[32].mxu1 %vm452_vm2, %v451_v24 }
 0x159   : > { %4667 = vmatprep.mubr.msk.f32.mxu1 %vm5495_vm1, %v5494_v1 }
 0x15a   : > { %v1226_v36 = vpop.f32.mrb[42].mxu0 }
 0x15b   : > { %v4763_v39 = vpop.f32.mrb[43].mxu0 }
 0x15c   : > { %4668 = vmatmul.mubr.msk.f32.vlgmr.msra.gmra.mrb[34].mxu1 %vm452_vm2, %v5708_v23 }
 0x15d   : > { %4670 = vmatprep.mubr.msk.f32.mxu1 %vm5495_vm1, %v5494_v1  ;;  %4963 = vmatpush3.msra.mxu1 %v4196_v28 }
 0x15e   : > { %v1231_v40 = vpop.f32.mrb[44].mxu0 }
 0x15f   : > { %v4766_v43 = vpop.f32.mrb[45].mxu0 }
 0x160   : > { %4671 = vmatmul.mubr.msk.f32.gmra.mrb[36].mxu1 %vm452_vm2, %v5716_v26  ;;  %v6219_v26 = vpop.f32.mrb[0].mxu1 }
 0x161   : > { %4673 = vmatprep.mubr.msk.f32.mxu1 %vm5495_vm1, %v5494_v1 }
 0x162   : > { %v1236_v45 = vpop.f32.mrb[46].mxu0 }
 0x163   : > { %v4769_v48 = vpop.f32.mrb[47].mxu0 }
 0x164   : > { %4674 = vmatmul.mubr.msk.f32.gmra.mrb[38].mxu1 %vm452_vm2, %v5724_v29  ;;  %v4595_v29 = vpop.f32.mrb[1].mxu1 }
 0x165   : > { %4676 = vmatprep.mubr.msk.f32.mxu1 %vm5495_vm1, %v5494_v1  ;;  %v6225_v31 = vpop.f32.mrb[2].mxu1  ;;  %v2102_v29 = vlaneseq }
 0x166   : > { %v1241_v51 = vpop.f32.mrb[48].mxu0  ;;  %v4598_v33 = vpop.f32.mrb[3].mxu1 }
 0x167   : > { %v4772_v54 = vpop.f32.mrb[49].mxu0  ;;  %v6231_v8 = vpop.f32.mrb[4].mxu1 }
 0x168   : > { %4677 = vmatmul.mubr.msk.f32.gmra.mrb[40].mxu1 %vm452_vm2, %v5732_v32  ;;  %v4601_v34 = vpop.f32.mrb[5].mxu1 }
 0x169   : > { %4679 = vmatprep.mubr.msk.f32.mxu1 %vm5495_vm1, %v5494_v1  ;;  %v4194_v34 = vld [vmem:[%s6697_s4] ss:$0 sm:$0xff] }
 0x16a   : > { %v1246_v56 = vpop.f32.mrb[50].mxu0 }
 0x16b   : > { %v4775_v58 = vpop.f32.mrb[51].mxu0 }
 0x16c   : > { %4680 = vmatmul.mubr.msk.f32.gmra.mrb[42].mxu1 %vm452_vm2, %v5740_v35 }
 0x16d   : > { %4682 = vmatprep.mubr.msk.f32.mxu1 %vm5495_vm1, %v5494_v1 }
 0x16e   : > { %v1251_v60 = vpop.f32.mrb[52].mxu0 }
 0x16f   : > { %v4778_v62 = vpop.f32.mrb[53].mxu0 }
 0x170   : > { %4683 = vmatmul.mubr.msk.f32.gmra.mrb[44].mxu1 %vm452_vm2, %v5748_v38 }
 0x171   : > { %4685 = vmatprep.mubr.msk.f32.mxu1 %vm5495_vm1, %v5494_v1 }
 0x172   : > { %v1256_v2 = vpop.f32.mrb[54].mxu0 }
 0x173   : > { %v4781_v12 = vpop.f32.mrb[55].mxu0 }
 0x174   : > { %4686 = vmatmul.mubr.msk.f32.gmra.mrb[46].mxu1 %vm452_vm2, %v5756_v41 }
 0x175   : > { %4688 = vmatprep.mubr.msk.f32.mxu1 %vm5495_vm1, %v5494_v1 }
 0x176   : > { %v1261_v0 = vpop.f32.mrb[56].mxu0 }
 0x177   : > { %v4784_v15 = vpop.f32.mrb[57].mxu0 }
 0x178   : > { %4689 = vmatmul.mubr.msk.f32.gmra.mrb[48].mxu1 %vm452_vm2, %v5764_v44  ;;  %v6246_v44 = vld [vmem:[%s6696_s3] sm:$0xff] }
 0x179   : > { %4691 = vmatprep.mubr.msk.f32.mxu1 %vm5495_vm1, %v5494_v1  ;;  %4988 = vmatprep.subr.mxu1 %v6246_v44 }
 0x17a   : > { %v1266_v17 = vpop.f32.mrb[58].mxu0 }
 0x17b   : > { %v4787_v19 = vpop.f32.mrb[59].mxu0 }
 0x17c   : > { %4692 = vmatmul.mubr.msk.f32.gmra.mrb[50].mxu1 %vm452_vm2, %v5774_v47 }
 0x17d   : > { %4694 = vmatprep.mubr.msk.f32.mxu1 %vm5495_vm1, %v5494_v1 }
 0x17e   : > { %v1271_v21 = vpop.f32.mrb[60].mxu0 }
 0x17f   : > { %v4790_v3 = vpop.f32.mrb[61].mxu0 }
 0x180   : > { %4695 = vmatmul.mubr.msk.f32.gmra.mrb[52].mxu1 %vm452_vm2, %v5787_v50 }
 0x182   : > { %v1276_v25 = vpop.f32.mrb[62].mxu0 }
 0x183   : > { %v4793_v27 = vpop.f32.mrb[63].mxu0 }
 0x186   : > { %v1281_v5 = vpop.f32.mrb[64].mxu0 }
 0x187   : > { %v4796_v53 = vpop.f32.mrb[65].mxu0 }
 0x18a   : > { %v1286_v7 = vpop.f32.mrb[66].mxu0 }
 0x18b   : > { %v4799_v30 = vpop.f32.mrb[67].mxu0 }
 0x18e   : > { %v1291_v23 = vpop.f32.mrb[68].mxu0 }
 0x18f   : > { %v4802_v11 = vpop.f32.mrb[69].mxu0 }
 0x19e   : > { %v1467_v32 = vpop.f32.mrb[70].mxu0 }
 0x19f   : > { %v4816_v35 = vpop.f32.mrb[71].mxu0 }
 0x1a0   : > { %v6250_v35 = vshrl.u32 %v2102_v29, 7 }
 0x1a2   : > { %v1472_v38 = vpop.f32.mrb[72].mxu0 }
 0x1a3   : > { %v4819_v36 = vpop.f32.mrb[73].mxu0 }
 0x1a6   : > { %v1477_v41 = vpop.f32.mrb[74].mxu0 }
 0x1a7   : > { %v4822_v9 = vpop.f32.mrb[75].mxu0 }
 0x1a8   : > { %v4195_v9 = vld [vmem:[%s6698_s5] ss:$0 sm:$0xff] }
 0x1aa   : > { %v1482_v37 = vpop.f32.mrb[76].mxu0 }
 0x1ab   : > { %v4825_v39 = vpop.f32.mrb[77].mxu0  ;;  %v2123_v37 = vadd.s32 4294967293, %v6250_v35 }
 0x1ad   : > { %vm2140_vm8 = vcmp.ge.s32.totalorder %v2123_v37, 0 }
 0x1ae   : > { %v1487_v40 = vpop.f32.mrb[78].mxu0 }
 0x1af   : > { %v4828_v42 = vpop.f32.mrb[79].mxu0  ;;  %v2105_v40 = vadd.s32 16, %v6250_v35 }
 0x1b2   : > { %v1492_v47 = vpop.f32.mrb[80].mxu0 }
 0x1b3   : > { %v4831_v43 = vpop.f32.mrb[81].mxu0 }
 0x1b6   : > { %v1497_v45 = vpop.f32.mrb[82].mxu0 }
 0x1b7   : > { %v4834_v46 = vpop.f32.mrb[83].mxu0 }
 0x1ba   : > { %v1502_v48 = vpop.f32.mrb[84].mxu0 }
 0x1bb   : > { %v4837_v49 = vpop.f32.mrb[85].mxu0 }
 0x1be   : > { %v1507_v51 = vpop.f32.mrb[86].mxu0 }
 0x1bf   : > { %v4840_v52 = vpop.f32.mrb[87].mxu0 }
 0x1c2   : > { %v1512_v50 = vpop.f32.mrb[88].mxu0 }
 0x1c3   : > { %v4843_v54 = vpop.f32.mrb[89].mxu0 }
 0x1c6   : > { %v1517_v55 = vpop.f32.mrb[90].mxu0 }
 0x1c7   : > { %v4846_v56 = vpop.f32.mrb[91].mxu0 }
 0x1ca   : > { %v1522_v57 = vpop.f32.mrb[92].mxu0 }
 0x1cb   : > { %v4849_v58 = vpop.f32.mrb[93].mxu0 }
 0x1ce   : > { %v1527_v59 = vpop.f32.mrb[94].mxu0 }
 0x1cf   : > { %v4852_v60 = vpop.f32.mrb[95].mxu0 }
 0x1d2   : > { %v1532_v61 = vpop.f32.mrb[96].mxu0 }
 0x1d3   : > { %v4855_v62 = vpop.f32.mrb[97].mxu0 }
 0x1e2   : > { %v1709_v63 = vpop.f32.mrb[98].mxu0 }
 0x1e3   : > { %v4869_v2 = vpop.f32.mrb[99].mxu0 }
 0x1e6   : > { %v1714_v10 = vpop.f32.mrb[100].mxu0 }
 0x1e7   : > { %v4872_v12 = vpop.f32.mrb[101].mxu0 }
 0x1ea   : > { %v1719_v13 = vpop.f32.mrb[102].mxu0 }
 0x1eb   : > { %v4875_v0 = vpop.f32.mrb[103].mxu0 }
 0x1ee   : > { %v1724_v14 = vpop.f32.mrb[104].mxu0 }
 0x1ef   : > { %v4878_v15 = vpop.f32.mrb[105].mxu0 }
 0x1f2   : > { %v1729_v16 = vpop.f32.mrb[106].mxu0 }
 0x1f3   : > { %v4881_v17 = vpop.f32.mrb[107].mxu0 }
 0x1f6   : > { %v1734_v18 = vpop.f32.mrb[108].mxu0 }
 0x1f7   : > { %v4884_v19 = vpop.f32.mrb[109].mxu0  ;;  %v572_v46 = vpop.f32.mrb[6].mxu1 }
 0x1f8   : > { %v4604_v51 = vpop.f32.mrb[7].mxu1 }
 0x1fa   : > { %v1739_v20 = vpop.f32.mrb[110].mxu0 }
 0x1fb   : > { %v4887_v21 = vpop.f32.mrb[111].mxu0  ;;  %v577_v57 = vpop.f32.mrb[8].mxu1 }
 0x1fc   : > { %v4607_v60 = vpop.f32.mrb[9].mxu1 }
 0x1fe   : > { %v1744_v22 = vpop.f32.mrb[112].mxu0 }
 0x1ff   : > { %v4890_v3 = vpop.f32.mrb[113].mxu0  ;;  %v582_v0 = vpop.f32.mrb[10].mxu1 }
 0x200   : > { %v4610_v22 = vpop.f32.mrb[11].mxu1  ;;  %v2233_v3 = vrot.slane %v5494_v1, 1 }
 0x202   : > { %v1749_v24 = vpop.f32.mrb[114].mxu0 }
 0x203   : > { %v4893_v25 = vpop.f32.mrb[115].mxu0 }
 0x206   : > { %v1754_v27 = vpop.f32.mrb[116].mxu0 }
 0x207   : > { %v4896_v5 = vpop.f32.mrb[117].mxu0 }
 0x20a   : > { %v1759_v28 = vpop.f32.mrb[118].mxu0 }
 0x20b   : > { %v4899_v53 = vpop.f32.mrb[119].mxu0 }
 0x20e   : > { %v1764_v7 = vpop.f32.mrb[120].mxu0 }
 0x20f   : > { %v4902_v30 = vpop.f32.mrb[121].mxu0 }
 0x210   : > { %v587_v30 = vpop.f32.mrb[12].mxu1 }
 0x212   : > { %v1769_v23 = vpop.f32.mrb[122].mxu0 }
 0x213   : > { %v4905_v11 = vpop.f32.mrb[123].mxu0 }
 0x214   : > { %v4613_v11 = vpop.f32.mrb[13].mxu1 }
 0x216   : > { %v1774_v32 = vpop.f32.mrb[124].mxu0 }
 0x217   : > { %v4908_v33 = vpop.f32.mrb[125].mxu0 }
 0x21a   : > { %v1936_v38 = vpop.f32.mrb[0].mxu0 }
 0x21b   : > { %v5213_v36 = vadd.f32 %v1936_v38, %v6219_v26  ;;  %v4913_v41 = vpop.f32.mrb[1].mxu0  ;;  %v2125_v26 = vadd.s32 4294967293, %v2105_v40 }
 0x21d   : > { %v2044_v39 = vmul.f32 %v5213_v36, %v4194_v34  ;;  %vm2159_vm10 = vcmp.lt.s32.totalorder %v2125_v26, 16  ;;  %v4216_v36 = vld [vmem:[%s6696_s3 + $0x10] sm:$0xff] }
 0x21e   : > { %v1941_v42 = vpop.f32.mrb[2].mxu0 }
 0x21f   : > { %v2068_v47 = vadd.f32 %v4195_v9, %v2044_v39  ;;  %v5214_v43 = vadd.f32 %v1941_v42, %v6225_v31  ;;  %v4916_v45 = vpop.f32.mrb[3].mxu0  ;;  %v592_v39 = vpop.f32.mrb[14].mxu1 }
 0x221   : > { %v2085_v48 = vmax.f32 %v2068_v47, 0.0  ;;  %v2045_v49 = vmul.f32 %v5214_v43, %v4194_v34  ;;  %v4616_v47 = vpop.f32.mrb[15].mxu1 }
 0x222   : > { %v1946_v52 = vpop.f32.mrb[4].mxu0 }
 0x223   : > { %v6262_v50 = vsel %vm2140_vm8, %v2085_v48, 0.0  ;;  %v2069_v54 = vadd.f32 %v4195_v9, %v2045_v49  ;;  %v5215_v55 = vadd.f32 %v1946_v52, %v6231_v8  ;;  %v4919_v56 = vpop.f32.mrb[5].mxu0 }
 0x224   : > { %v2228_v31 = vrot.slane %v6262_v50, 1  ;;  %v2618_v61 = vrot.slane %v6262_v50, 2  ;;  %v2846_v62 = vrot.slane %v6262_v50, 3  ;;  %v3074_v63 = vrot.slane %v6262_v50, 4 }
 0x225   : > { %v6265_v58 = vmax.f32 %v2069_v54, 0.0  ;;  %v2046_v59 = vmul.f32 %v5215_v55, %v4194_v34  ;;  %v3302_v2 = vrot.slane %v6262_v50, 5  ;;  %v3530_v16 = vrot.slane %v6262_v50, 6 }
 0x227   : > { %v2070_v10 = vadd.f32 %v4195_v9, %v2046_v59  ;;  %v2229_v8 = vrot.slane %v6265_v58, 1  ;;  %v2619_v12 = vrot.slane %v6265_v58, 2  ;;  %v2847_v13 = vrot.slane %v6265_v58, 3 }
 0x228   : > { %v3075_v14 = vrot.slane %v6265_v58, 4  ;;  %v3303_v15 = vrot.slane %v6265_v58, 5  ;;  %v3531_v17 = vrot.slane %v6265_v58, 6 }
 0x229   : > { %v2087_v18 = vmax.f32 %v2070_v10, 0.0  ;;  %v2230_v19 = vsel %vm416_vm5, %v2228_v31, %v2229_v8  ;;  %v6281_v20 = vsel %vm830_vm3, %v2618_v61, %v2619_v12  ;;  %v6284_v21 = vsel %vm1072_vm4, %v2846_v62, %v2847_v13  ;;  %v4233_v31 = vld [vmem:[%s6696_s3 + $0x18] sm:$0xff] }
 0x22a   : > { %4964 = vmatprep.mubr.msk.f32.mxu1 %vm2261_vm9, %v2230_v19  ;;  %v6289_v24 = vsel %vm487_vm0, %v3074_v63, %v3075_v14  ;;  %v6292_v25 = vsel %vm1555_vm6, %v3302_v2, %v3303_v15  ;;  %v6295_v27 = vsel %vm1797_vm7, %v3530_v16, %v3531_v17  ;;  %v2623_v16 = vrot.slane %v5494_v1, 2  ;;  %v4250_v19 = vld [vmem:[%s6696_s3 + $0x20] sm:$0xff] }
 0x22b   : > { %v6298_v5 = vsel %vm2159_vm10, %v2087_v18, 0.0 }
 0x22c   : > { %v2231_v28 = vrot.slane %v6298_v5, 1  ;;  %v2621_v53 = vrot.slane %v6298_v5, 2  ;;  %v2849_v7 = vrot.slane %v6298_v5, 3  ;;  %v3077_v23 = vrot.slane %v6298_v5, 4 }
 0x22d   : > { %v3305_v32 = vrot.slane %v6298_v5, 5  ;;  %v3533_v33 = vrot.slane %v6298_v5, 6 }
 0x22e   : > { %v2232_v38 = vsel %vm416_vm5, %v2229_v8, %v2231_v28  ;;  %v2234_v34 = vsel %vm416_vm5, %v2231_v28, %v2233_v3  ;;  %v6314_v41 = vsel %vm830_vm3, %v2619_v12, %v2621_v53  ;;  %v6320_v9 = vsel %vm1072_vm4, %v2847_v13, %v2849_v7 }
 0x22f   : > { %4965 = vmatmul.mubr.msk.f32.vlgmr.msra.gmra.mrb[54].mxu1 %vm2261_vm9, %v2232_v38  ;;  %v6325_v37 = vsel %vm487_vm0, %v3075_v14, %v3077_v23  ;;  %v6332_v40 = vsel %vm1555_vm6, %v3303_v15, %v3305_v32  ;;  %v6337_v42 = vsel %vm1797_vm7, %v3531_v17, %v3533_v33  ;;  %v2624_v22 = vsel %vm830_vm3, %v2621_v53, %v2623_v16 }
 0x230   : > { %4989 = vmatpush3.msra.mxu1 %v6246_v44  ;;  %4967 = vmatprep.mubr.msk.f32.mxu1 %vm2261_vm9, %v2234_v34  ;;  %v597_v44 = vpop.f32.mrb[16].mxu1 }
 0x231   : > { %5014 = vmatprep.subr.mxu1 %v4216_v36  ;;  %v4619_v43 = vpop.f32.mrb[17].mxu1  ;;  %v5402_v44 = vld [vmem:[%s5622_s25 + $0x30] sm:$0xff] }
 0x232   : > { %v602_v45 = vpop.f32.mrb[18].mxu1  ;;  %v1809_v6 = vrot.slane %v5402_v44, 6  ;;  %v5403_v43 = vld [vmem:[%s5622_s25 + $0x38] sm:$0xff] }
 0x233   : > { %4968 = vmatmul.mubr.msk.f32.gmra.mrb[56].mxu1 %vm2261_vm9, %v2233_v3  ;;  %v4622_v46 = vpop.f32.mrb[19].mxu1  ;;  %v1811_v45 = vrot.slane %v5403_v43, 6 }
 0x234   : > { %4970 = vmatprep.mubr.msk.f32.mxu1 %vm2261_vm9, %v2233_v3  ;;  %v607_v48 = vpop.f32.mrb[20].mxu1 }
 0x235   : > { %v4625_v49 = vpop.f32.mrb[21].mxu1  ;;  %v1812_v46 = vsel %vm1797_vm7, %v1809_v6, %v1811_v45  ;;  %v5404_v48 = vld [vmem:[%s5622_s25 + $0x40] sm:$0xff] }
 0x236   : > { %v612_v26 = vpop.f32.mrb[22].mxu1  ;;  %v1813_v49 = vrot.slane %v5404_v48, 6 }
 0x237   : > { %4971 = vmatmul.mubr.msk.f32.gmra.mrb[58].mxu1 %vm2261_vm9, %v2233_v3  ;;  %v4628_v51 = vpop.f32.mrb[23].mxu1  ;;  %v5405_v26 = vld [vmem:[%s5622_s25 + $0x48] sm:$0xff] }
 0x238   : > { %4973 = vmatprep.mubr.msk.f32.mxu1 %vm2261_vm9, %v2233_v3  ;;  %v617_v52 = vpop.f32.mrb[24].mxu1  ;;  %v1815_v51 = vrot.slane %v5405_v26, 6 }
 0x239   : > { %v4631_v54 = vpop.f32.mrb[25].mxu1  ;;  %v1814_v52 = vsel %vm1797_vm7, %v1811_v45, %v1813_v49 }
 0x23a   : > { %v622_v55 = vpop.f32.mrb[26].mxu1  ;;  %v1816_v54 = vsel %vm1797_vm7, %v1813_v49, %v1815_v51 }
 0x23b   : > { %4974 = vmatmul.mubr.msk.f32.gmra.mrb[60].mxu1 %vm2261_vm9, %v2233_v3  ;;  %v4634_v56 = vpop.f32.mrb[27].mxu1  ;;  %v5406_v55 = vld [vmem:[%s5622_s25 + $0x50] sm:$0xff] }
 0x23c   : > { %4976 = vmatprep.mubr.msk.f32.mxu1 %vm2261_vm9, %v2233_v3  ;;  %v627_v57 = vpop.f32.mrb[28].mxu1  ;;  %v1817_v56 = vrot.slane %v5406_v55, 6 }
 0x23d   : > { %v4637_v59 = vpop.f32.mrb[29].mxu1 }
 0x23e   : > { %v632_v60 = vpop.f32.mrb[30].mxu1  ;;  %v1818_v57 = vsel %vm1797_vm7, %v1815_v51, %v1817_v56  ;;  %v5407_v59 = vld [vmem:[%s5622_s25 + $0x58] sm:$0xff] }
 0x23f   : > { %4977 = vmatmul.mubr.msk.f32.gmra.mrb[62].mxu1 %vm2261_vm9, %v2233_v3  ;;  %v4640_v61 = vpop.f32.mrb[31].mxu1 }
 0x240   : > { %4979 = vmatprep.mubr.msk.f32.mxu1 %vm2261_vm9, %v2233_v3  ;;  %v5408_v61 = vld [vmem:[%s5622_s25 + $0x60] sm:$0xff] }
 0x243   : > { %4980 = vmatmul.mubr.msk.f32.gmra.mrb[64].mxu1 %vm2261_vm9, %v2233_v3 }
 0x244   : > { %4982 = vmatprep.mubr.msk.f32.mxu1 %vm2261_vm9, %v2233_v3 }
 0x247   : > { %4983 = vmatmul.mubr.msk.f32.gmra.mrb[66].mxu1 %vm2261_vm9, %v2233_v3 }
 0x248   : > { %4985 = vmatprep.mubr.msk.f32.mxu1 %vm2261_vm9, %v2233_v3 }
 0x24b   : > { %4986 = vmatmul.mubr.msk.f32.gmra.mrb[68].mxu1 %vm2261_vm9, %v2233_v3 }
 0x24c   : > { %4990 = vmatprep.mubr.msk.f32.mxu1 %vm2261_vm9, %v6262_v50  ;;  %v637_v50 = vpop.f32.mrb[32].mxu1 }
 0x24d   : > { %v4643_v62 = vpop.f32.mrb[33].mxu1  ;;  %v1821_v50 = vrot.slane %v5408_v61, 6 }
 0x24e   : > { %v779_v63 = vpop.f32.mrb[34].mxu1 }
 0x24f   : > { %4991 = vmatmul.mubr.msk.f32.vlgmr.msra.gmra.mrb[54].mxu1 %vm2261_vm9, %v6265_v58  ;;  %v4669_v2 = vpop.f32.mrb[35].mxu1  ;;  %v5409_v63 = vld [vmem:[%s5622_s25 + $0x68] sm:$0xff] }
 0x250   : > { %5015 = vmatpush3.msra.mxu1 %v4216_v36  ;;  %4993 = vmatprep.mubr.msk.f32.mxu1 %vm2261_vm9, %v6298_v5  ;;  %v784_v58 = vpop.f32.mrb[36].mxu1  ;;  %v2851_v36 = vrot.slane %v5494_v1, 3  ;;  %v5400_v5 = vld [vmem:[%s5622_s25 + $0x20] sm:$0xff]  ;;  %v1823_v2 = vrot.slane %v5409_v63, 6 }
 0x251   : > { %5040 = vmatprep.subr.mxu1 %v4233_v31  ;;  %v4672_v10 = vpop.f32.mrb[37].mxu1 }
 0x252   : > { %v789_v8 = vpop.f32.mrb[38].mxu1  ;;  %v2852_v39 = vsel %vm1072_vm4, %v2849_v7, %v2851_v36  ;;  %v4284_v7 = vld [vmem:[%s6696_s3 + $0x30] sm:$0xff]  ;;  %v1824_v58 = vsel %vm1797_vm7, %v1821_v50, %v1823_v2 }
 0x253   : > { %4994 = vmatmul.mubr.f32.gmra.mrb[56].mxu1 %v5494_v1  ;;  %v4675_v12 = vpop.f32.mrb[39].mxu1  ;;  %v5410_v10 = vld [vmem:[%s5622_s25 + $0x70] sm:$0xff] }
 0x254   : > { %4996 = vmatprep.mubr.f32.mxu1 %v5494_v1  ;;  %v794_v13 = vpop.f32.mrb[40].mxu1  ;;  %v1825_v8 = vrot.slane %v5410_v10, 6 }
 0x255   : > { %v4678_v0 = vpop.f32.mrb[41].mxu1  ;;  %v5411_v13 = vld [vmem:[%s5622_s25 + $0x78] sm:$0xff] }
 0x256   : > { %v799_v14 = vpop.f32.mrb[42].mxu1  ;;  %v1826_v12 = vsel %vm1797_vm7, %v1823_v2, %v1825_v8  ;;  %v1827_v0 = vrot.slane %v5411_v13, 6 }
 0x257   : > { %4997 = vmatmul.mubr.f32.gmra.mrb[58].mxu1 %v5494_v1  ;;  %v4681_v15 = vpop.f32.mrb[43].mxu1 }
 0x258   : > { %4999 = vmatprep.mubr.f32.mxu1 %v5494_v1  ;;  %v804_v17 = vpop.f32.mrb[44].mxu1  ;;  %v1828_v14 = vsel %vm1797_vm7, %v1825_v8, %v1827_v0  ;;  %v5412_v15 = vld [vmem:[%s5779_s23] sm:$0xff] }
 0x259   : > { %v4684_v18 = vpop.f32.mrb[45].mxu1 }
 0x25a   : > { %v809_v3 = vpop.f32.mrb[46].mxu1  ;;  %v5413_v18 = vld [vmem:[%s5779_s23 + $0x8] sm:$0xff]  ;;  %s352_s23 = sand.u32 1, %s5476_s28  }
 0x25b   : > { %5000 = vmatmul.mubr.f32.gmra.mrb[60].mxu1 %v5494_v1  ;;  %v4687_v28 = vpop.f32.mrb[47].mxu1  ;;  %v6569_v3 = vld [vmem:[%s6699_s6] ss:$0 sm:$0xff]  ;;  %s4057_s20 = sshll.u32 %s352_s23, 3 }
 0x25c   : > { %5002 = vmatprep.mubr.f32.mxu1 %v5494_v1  ;;  %s354_s21 = scalar_lea.vmem [#allocation2], %s4057_s20 }
 0x25d   : > { %s3960_s22 = sshll.u32 %s354_s21, 4  ;;  %s6643_s22 = int_to_ptr.vmem [resolvable:$true] %s3960_s22 }
 0x25e   : > { %s5414_s14 = scalar_lea.vmem %s6643_s22, 128  ;;  %p5421_p1 = scmp.lt.s32.totalorder %s6643_s22, %s5419_s16 }
 0x25f   : > { %5003 = vmatmul.mubr.f32.gmra.mrb[62].mxu1 %v5494_v1  ;;  %p5415_p12 = scmp.ne.s32.totalorder %s6643_s22, %s5414_s14  ;;  %p5422_p2 = scmp.lt.s32.totalorder %s5420_s19, %s5414_s14 }
 0x260   : > { %5005 = vmatprep.mubr.f32.mxu1 %v5494_v1 }
 0x261   : > { %p5416_p13 = pnand %p5415_p12, %p5583_p4  ;;  %p5423_p3 = por %p5422_p2, %p5421_p1 }
 0x263   : > { %5006 = vmatmul.mubr.f32.gmra.mrb[64].mxu1 %v5494_v1  ;;  %p5417_p0 = pneg %p5416_p13 }
 0x264   : > { %5008 = vmatprep.mubr.f32.mxu1 %v5494_v1 }
 0x265   : > { %p5424_p5 = pnand %p5423_p3, %p5417_p0 }
 0x267   : > { %5009 = vmatmul.mubr.f32.gmra.mrb[66].mxu1 %v5494_v1 }
 0x268   : > { %5011 = vmatprep.mubr.f32.mxu1 %v5494_v1 }
 0x26b   : > { %5012 = vmatmul.mubr.f32.gmra.mrb[68].mxu1 %v5494_v1 }
 0x26c   : > { %5016 = vmatprep.mubr.msk.f32.mxu1 %vm2261_vm9, %v6281_v20  ;;  %v814_v20 = vpop.f32.mrb[48].mxu1 }
 0x26d   : > { %v4690_v30 = vpop.f32.mrb[49].mxu1  ;;  %v6574_v20 = vld [vmem:[%s6700_s7] ss:$0 sm:$0xff] }
 0x26e   : > { %v819_v11 = vpop.f32.mrb[50].mxu1 }
 0x26f   : > { %5017 = vmatmul.mubr.msk.f32.vlgmr.msra.gmra.mrb[54].mxu1 %vm2261_vm9, %v6314_v41  ;;  %v4693_v38 = vpop.f32.mrb[51].mxu1  ;;  %v4267_v41 = vld [vmem:[%s6696_s3 + $0x28] sm:$0xff] }
 0x270   : > { %5041 = vmatpush3.msra.mxu1 %v4233_v31  ;;  %5019 = vmatprep.mubr.msk.f32.mxu1 %vm2261_vm9, %v2624_v22  ;;  %v824_v53 = vpop.f32.mrb[52].mxu1  ;;  %v1819_v31 = vrot.slane %v5407_v59, 6 }
 0x271   : > { %5066 = vmatprep.subr.mxu1 %v4250_v19  ;;  %v4696_v34 = vpop.f32.mrb[53].mxu1 }
 0x272   : > { %v1820_v60 = vsel %vm1797_vm7, %v1817_v56, %v1819_v31  ;;  %v1822_v62 = vsel %vm1797_vm7, %v1819_v31, %v1821_v50 }
 0x273   : > { %5020 = vmatmul.mubr.msk.f32.gmra.mrb[56].mxu1 %vm2261_vm9, %v2623_v16 }
 0x274   : > { %5022 = vmatprep.mubr.msk.f32.mxu1 %vm2261_vm9, %v2623_v16 }
 0x277   : > { %5023 = vmatmul.mubr.msk.f32.gmra.mrb[58].mxu1 %vm2261_vm9, %v2623_v16 }
 0x278   : > { %5025 = vmatprep.mubr.msk.f32.mxu1 %vm2261_vm9, %v2623_v16 }
 0x27b   : > { %5026 = vmatmul.mubr.msk.f32.gmra.mrb[60].mxu1 %vm2261_vm9, %v2623_v16 }
 0x27c   : > { %5028 = vmatprep.mubr.msk.f32.mxu1 %vm2261_vm9, %v2623_v16 }
 0x27f   : > { %5029 = vmatmul.mubr.msk.f32.gmra.mrb[62].mxu1 %vm2261_vm9, %v2623_v16 }
 0x280   : > { %5031 = vmatprep.mubr.msk.f32.mxu1 %vm2261_vm9, %v2623_v16 }
 0x283   : > { %5032 = vmatmul.mubr.msk.f32.gmra.mrb[64].mxu1 %vm2261_vm9, %v2623_v16 }
 0x284   : > { %5034 = vmatprep.mubr.msk.f32.mxu1 %vm2261_vm9, %v2623_v16 }
 0x287   : > { %5035 = vmatmul.mubr.msk.f32.gmra.mrb[66].mxu1 %vm2261_vm9, %v2623_v16 }
 0x288   : > { %5037 = vmatprep.mubr.msk.f32.mxu1 %vm2261_vm9, %v2623_v16 }
 0x28b   : > { %5038 = vmatmul.mubr.msk.f32.gmra.mrb[68].mxu1 %vm2261_vm9, %v2623_v16  ;;  %v1829_v16 = vrot.slane %v5412_v15, 6 }
 0x28c   : > { %5042 = vmatprep.mubr.msk.f32.mxu1 %vm2261_vm9, %v6284_v21  ;;  %v3079_v21 = vrot.slane %v5494_v1, 4 }
 0x28d   : > { %v1830_v17 = vsel %vm1797_vm7, %v1827_v0, %v1829_v16 }
 0x28f   : > { %5043 = vmatmul.mubr.msk.f32.vlgmr.msra.gmra.mrb[54].mxu1 %vm2261_vm9, %v6320_v9  ;;  %v3080_v9 = vsel %vm487_vm0, %v3077_v23, %v3079_v21 }
 0x290   : > { %5067 = vmatpush3.msra.mxu1 %v4250_v19  ;;  %5045 = vmatprep.mubr.msk.f32.mxu1 %vm2261_vm9, %v2852_v39  ;;  %v1831_v19 = vrot.slane %v5413_v18, 6 }
 0x291   : > { %5092 = vmatprep.subr.mxu1 %v4267_v41 }
 0x292   : > { %v1832_v22 = vsel %vm1797_vm7, %v1829_v16, %v1831_v19 }
 0x293   : > { %5046 = vmatmul.mubr.msk.f32.gmra.mrb[56].mxu1 %vm2261_vm9, %v2851_v36 }
 0x294   : > { %5048 = vmatprep.mubr.msk.f32.mxu1 %vm2261_vm9, %v2851_v36 }
 0x297   : > { %5049 = vmatmul.mubr.msk.f32.gmra.mrb[58].mxu1 %vm2261_vm9, %v2851_v36 }
 0x298   : > { %5051 = vmatprep.mubr.msk.f32.mxu1 %vm2261_vm9, %v2851_v36 }
 0x29b   : > { %5052 = vmatmul.mubr.msk.f32.gmra.mrb[60].mxu1 %vm2261_vm9, %v2851_v36 }
 0x29c   : > { %5054 = vmatprep.mubr.msk.f32.mxu1 %vm2261_vm9, %v2851_v36 }
 0x29f   : > { %5055 = vmatmul.mubr.msk.f32.gmra.mrb[62].mxu1 %vm2261_vm9, %v2851_v36 }
 0x2a0   : > { %5057 = vmatprep.mubr.msk.f32.mxu1 %vm2261_vm9, %v2851_v36 }
 0x2a3   : > { %5058 = vmatmul.mubr.msk.f32.gmra.mrb[64].mxu1 %vm2261_vm9, %v2851_v36 }
 0x2a4   : > { %5060 = vmatprep.mubr.msk.f32.mxu1 %vm2261_vm9, %v2851_v36 }
 0x2a7   : > { %5061 = vmatmul.mubr.msk.f32.gmra.mrb[66].mxu1 %vm2261_vm9, %v2851_v36 }
 0x2a8   : > { %5063 = vmatprep.mubr.msk.f32.mxu1 %vm2261_vm9, %v2851_v36 }
 0x2ab   : > { %5064 = vmatmul.mubr.msk.f32.gmra.mrb[68].mxu1 %vm2261_vm9, %v2851_v36 }
 0x2ac   : > { %5068 = vmatprep.mubr.msk.f32.mxu1 %vm2261_vm9, %v6289_v24  ;;  %v3307_v24 = vrot.slane %v5494_v1, 5 }
 0x2ae   : > { %v3308_v23 = vsel %vm1555_vm6, %v3305_v32, %v3307_v24 }
 0x2af   : > { %5069 = vmatmul.mubr.msk.f32.vlgmr.msra.gmra.mrb[54].mxu1 %vm2261_vm9, %v6325_v37 }
 0x2b0   : > { %5093 = vmatpush3.msra.mxu1 %v4267_v41  ;;  %5071 = vmatprep.mubr.msk.f32.mxu1 %vm2261_vm9, %v3080_v9 }
 0x2b1   : > { %5118 = vmatprep.subr.mxu1 %v4284_v7 }
 0x2b3   : > { %5072 = vmatmul.mubr.msk.f32.gmra.mrb[56].mxu1 %vm2261_vm9, %v3079_v21 }
 0x2b4   : > { %5074 = vmatprep.mubr.msk.f32.mxu1 %vm2261_vm9, %v3079_v21 }
 0x2b7   : > { %5075 = vmatmul.mubr.msk.f32.gmra.mrb[58].mxu1 %vm2261_vm9, %v3079_v21 }
 0x2b8   : > { %5077 = vmatprep.mubr.msk.f32.mxu1 %vm2261_vm9, %v3079_v21 }
 0x2bb   : > { %5078 = vmatmul.mubr.msk.f32.gmra.mrb[60].mxu1 %vm2261_vm9, %v3079_v21 }
 0x2bc   : > { %5080 = vmatprep.mubr.msk.f32.mxu1 %vm2261_vm9, %v3079_v21 }
 0x2bf   : > { %5081 = vmatmul.mubr.msk.f32.gmra.mrb[62].mxu1 %vm2261_vm9, %v3079_v21 }
 0x2c0   : > { %5083 = vmatprep.mubr.msk.f32.mxu1 %vm2261_vm9, %v3079_v21 }
 0x2c3   : > { %5084 = vmatmul.mubr.msk.f32.gmra.mrb[64].mxu1 %vm2261_vm9, %v3079_v21 }
 0x2c4   : > { %5086 = vmatprep.mubr.msk.f32.mxu1 %vm2261_vm9, %v3079_v21 }
 0x2c7   : > { %5087 = vmatmul.mubr.msk.f32.gmra.mrb[66].mxu1 %vm2261_vm9, %v3079_v21 }
 0x2c8   : > { %5089 = vmatprep.mubr.msk.f32.mxu1 %vm2261_vm9, %v3079_v21 }
 0x2cb   : > { %5090 = vmatmul.mubr.msk.f32.gmra.mrb[68].mxu1 %vm2261_vm9, %v3079_v21 }
 0x2cc   : > { %5094 = vmatprep.mubr.msk.f32.mxu1 %vm2261_vm9, %v6292_v25  ;;  %v3535_v25 = vrot.slane %v5494_v1, 6 }
 0x2ce   : > { %v3536_v32 = vsel %vm1797_vm7, %v3533_v33, %v3535_v25  ;;  %v1805_v33 = vrot.slane %v5400_v5, 6 }
 0x2cf   : > { %5095 = vmatmul.mubr.msk.f32.vlgmr.msra.gmra.mrb[54].mxu1 %vm2261_vm9, %v6332_v40  ;;  %v5401_v40 = vld [vmem:[%s5622_s25 + $0x28] sm:$0xff]  ;;  %s3946_s25 = scalar_lea.sflag [#allocation3], %s352_s23 }
 0x2d0   : > { %5119 = vmatpush3.msra.mxu1 %v4284_v7  ;;  %5097 = vmatprep.mubr.msk.f32.mxu1 %vm2261_vm9, %v3308_v23  ;;  %v1806_v37 = vsel %vm1797_vm7, %v1803_v4, %v1805_v33 }
 0x2d1   : > { %4921 = vmatmul.mubr.msk.f32.gmra.mrb[126].mxu0 %vm452_vm2, %v1806_v37 }
 0x2d2   : > { %4923 = vmatprep.mubr.msk.f32.mxu0 %vm5495_vm1, %v5494_v1 }
 0x2d3   : > { %5098 = vmatmul.mubr.msk.f32.gmra.mrb[56].mxu1 %vm2261_vm9, %v3307_v24 }
 0x2d4   : > { %5100 = vmatprep.mubr.msk.f32.mxu1 %vm2261_vm9, %v3307_v24 }
 0x2d7   : > { %5101 = vmatmul.mubr.msk.f32.gmra.mrb[58].mxu1 %vm2261_vm9, %v3307_v24 }
 0x2d8   : > { %5103 = vmatprep.mubr.msk.f32.mxu1 %vm2261_vm9, %v3307_v24 }
 0x2db   : > { %5104 = vmatmul.mubr.msk.f32.gmra.mrb[60].mxu1 %vm2261_vm9, %v3307_v24 }
 0x2dc   : > { %5106 = vmatprep.mubr.msk.f32.mxu1 %vm2261_vm9, %v3307_v24 }
 0x2df   : > { %5107 = vmatmul.mubr.msk.f32.gmra.mrb[62].mxu1 %vm2261_vm9, %v3307_v24 }
 0x2e0   : > { %5109 = vmatprep.mubr.msk.f32.mxu1 %vm2261_vm9, %v3307_v24 }
 0x2e3   : > { %5110 = vmatmul.mubr.msk.f32.gmra.mrb[64].mxu1 %vm2261_vm9, %v3307_v24 }
 0x2e4   : > { %5112 = vmatprep.mubr.msk.f32.mxu1 %vm2261_vm9, %v3307_v24 }
 0x2e7   : > { %5113 = vmatmul.mubr.msk.f32.gmra.mrb[66].mxu1 %vm2261_vm9, %v3307_v24 }
 0x2e8   : > { %5115 = vmatprep.mubr.msk.f32.mxu1 %vm2261_vm9, %v3307_v24 }
 0x2eb   : > { %5116 = vmatmul.mubr.msk.f32.gmra.mrb[68].mxu1 %vm2261_vm9, %v3307_v24 }
 0x2ec   : > { %5120 = vmatprep.mubr.msk.f32.mxu1 %vm2261_vm9, %v6295_v27  ;;  %v5496_v27 = vmov 0.0|0.0  }
 0x2ed   : > { %5179 = vmatprep.subr.bf16.mxu1 %v5496_v27 }
 0x2ef   : > { %5121 = vmatmul.mubr.msk.f32.vlgmr.msra.gmra.mrb[54].mxu1 %vm2261_vm9, %v6337_v42  ;;  %v1807_v42 = vrot.slane %v5401_v40, 6 }
 0x2f0   : > { %5123 = vmatprep.mubr.msk.f32.mxu1 %vm2261_vm9, %v3536_v32 }
 0x2f1   : > { %v1808_v47 = vsel %vm1797_vm7, %v1805_v33, %v1807_v42  ;;  %v1810_v4 = vsel %vm1797_vm7, %v1807_v42, %v1809_v6 }
 0x2f2   : > { %4924 = vmatmul.mubr.msk.f32.gmra.mrb[128].mxu0 %vm452_vm2, %v1808_v47 }
 0x2f3   : > { %5124 = vmatmul.mubr.msk.f32.gmra.mrb[56].mxu1 %vm2261_vm9, %v3535_v25  ;;  %4926 = vmatprep.mubr.msk.f32.mxu0 %vm5495_vm1, %v5494_v1 }
 0x2f4   : > { %5126 = vmatprep.mubr.msk.f32.mxu1 %vm2261_vm9, %v3535_v25 }
 0x2f6   : > { %4927 = vmatmul.mubr.msk.f32.gmra.mrb[130].mxu0 %vm452_vm2, %v1810_v4 }
 0x2f7   : > { %5127 = vmatmul.mubr.msk.f32.gmra.mrb[58].mxu1 %vm2261_vm9, %v3535_v25  ;;  %4929 = vmatprep.mubr.msk.f32.mxu0 %vm5495_vm1, %v5494_v1 }
 0x2f8   : > { %5129 = vmatprep.mubr.msk.f32.mxu1 %vm2261_vm9, %v3535_v25 }
 0x2fa   : > { %4930 = vmatmul.mubr.msk.f32.gmra.mrb[132].mxu0 %vm452_vm2, %v1812_v46 }
 0x2fb   : > { %5130 = vmatmul.mubr.msk.f32.gmra.mrb[60].mxu1 %vm2261_vm9, %v3535_v25  ;;  %4932 = vmatprep.mubr.msk.f32.mxu0 %vm5495_vm1, %v5494_v1 }
 0x2fc   : > { %5132 = vmatprep.mubr.msk.f32.mxu1 %vm2261_vm9, %v3535_v25 }
 0x2fe   : > { %4933 = vmatmul.mubr.msk.f32.gmra.mrb[134].mxu0 %vm452_vm2, %v1814_v52 }
 0x2ff   : > { %5133 = vmatmul.mubr.msk.f32.gmra.mrb[62].mxu1 %vm2261_vm9, %v3535_v25  ;;  %4935 = vmatprep.mubr.msk.f32.mxu0 %vm5495_vm1, %v5494_v1 }
 0x300   : > { %5135 = vmatprep.mubr.msk.f32.mxu1 %vm2261_vm9, %v3535_v25 }
 0x302   : > { %4936 = vmatmul.mubr.msk.f32.gmra.mrb[136].mxu0 %vm452_vm2, %v1816_v54 }
 0x303   : > { %5136 = vmatmul.mubr.msk.f32.gmra.mrb[64].mxu1 %vm2261_vm9, %v3535_v25  ;;  %4938 = vmatprep.mubr.msk.f32.mxu0 %vm5495_vm1, %v5494_v1 }
 0x304   : > { %5138 = vmatprep.mubr.msk.f32.mxu1 %vm2261_vm9, %v3535_v25 }
 0x306   : > { %4939 = vmatmul.mubr.msk.f32.gmra.mrb[138].mxu0 %vm452_vm2, %v1818_v57 }
 0x307   : > { %5139 = vmatmul.mubr.msk.f32.gmra.mrb[66].mxu1 %vm2261_vm9, %v3535_v25  ;;  %4941 = vmatprep.mubr.msk.f32.mxu0 %vm5495_vm1, %v5494_v1 }
 0x308   : > { %5141 = vmatprep.mubr.msk.f32.mxu1 %vm2261_vm9, %v3535_v25 }
 0x30a   : > { %4942 = vmatmul.mubr.msk.f32.gmra.mrb[140].mxu0 %vm452_vm2, %v1820_v60 }
 0x30b   : > { %5142 = vmatmul.mubr.msk.f32.gmra.mrb[68].mxu1 %vm2261_vm9, %v3535_v25  ;;  %4944 = vmatprep.mubr.msk.f32.mxu0 %vm5495_vm1, %v5494_v1 }
 0x30c   : > { %5176 = vmatprep.mubr.msk.f32.mxu1 %vm5495_vm1, %v5494_v1 }
 0x30e   : > { %4945 = vmatmul.mubr.msk.f32.gmra.mrb[142].mxu0 %vm452_vm2, %v1822_v62 }
 0x30f   : > { %4947 = vmatprep.mubr.msk.f32.mxu0 %vm5495_vm1, %v5494_v1 }
 0x312   : > { %4948 = vmatmul.mubr.msk.f32.gmra.mrb[144].mxu0 %vm452_vm2, %v1824_v58 }
 0x313   : > { %4950 = vmatprep.mubr.msk.f32.mxu0 %vm5495_vm1, %v5494_v1 }
 0x316   : > { %4951 = vmatmul.mubr.msk.f32.gmra.mrb[146].mxu0 %vm452_vm2, %v1826_v12 }
 0x317   : > { %4953 = vmatprep.mubr.msk.f32.mxu0 %vm5495_vm1, %v5494_v1 }
 0x31a   : > { %4954 = vmatmul.mubr.msk.f32.gmra.mrb[148].mxu0 %vm452_vm2, %v1828_v14 }
 0x31b   : > { %4956 = vmatprep.mubr.msk.f32.mxu0 %vm5495_vm1, %v5494_v1 }
 0x31e   : > { %4957 = vmatmul.mubr.msk.f32.gmra.mrb[150].mxu0 %vm452_vm2, %v1830_v17 }
 0x31f   : > { %4959 = vmatprep.mubr.msk.f32.mxu0 %vm5495_vm1, %v5494_v1 }
 0x322   : > { %4960 = vmatmul.mubr.msk.f32.gmra.mrb[152].mxu0 %vm452_vm2, %v1832_v22 }
 0x3c2   : > { %v5122_v28 = vpop.f32.mrb[54].mxu1 }
 0x3c3   : > { %v3764_v30 = vmul.f32 %v5122_v28, %v6569_v3  ;;  %v3661_v11 = vpop.f32.mrb[55].mxu1 }
 0x3c4   : > { %v3763_v38 = vmul.f32 %v6569_v3, %v3661_v11 }
 0x3c5   : > { %v3787_v53 = vadd.f32 %v6574_v20, %v3764_v30 }
 0x3c6   : > { %v3786_v34 = vadd.f32 %v6574_v20, %v3763_v38  ;;  %v5125_v36 = vpop.f32.mrb[56].mxu1 }
 0x3c7   : > { %v3803_v41 = vmax.f32 %v3787_v53, 0.0  ;;  %v3766_v39 = vmul.f32 %v5125_v36, %v6569_v3  ;;  %v3671_v21 = vpop.f32.mrb[57].mxu1 }
 0x3c8   : > { %v3802_v7 = vmax.f32 %v3786_v34, 0.0  ;;  %v3765_v9 = vmul.f32 %v6569_v3, %v3671_v21 }
 0x3c9   : > { %v3789_v24 = vadd.f32 %v6574_v20, %v3766_v39 }
 0x3ca   : > { %v5180_v25 = vpack.c.bf16 %v3803_v41, %v3802_v7  ;;  %v3788_v32 = vadd.f32 %v6574_v20, %v3765_v9  ;;  %v5128_v5 = vpop.f32.mrb[58].mxu1 }
 0x3cb   : > { %v3805_v33 = vmax.f32 %v3789_v24, 0.0  ;;  %v3768_v37 = vmul.f32 %v5128_v5, %v6569_v3  ;;  %v3681_v40 = vpop.f32.mrb[59].mxu1  ;;  %v1951_v5 = vpop.f32.mrb[126].mxu0 }
 0x3cc   : > { %v3804_v42 = vmax.f32 %v3788_v32, 0.0  ;;  %v3767_v47 = vmul.f32 %v6569_v3, %v3681_v40  ;;  %5182 = vmatpush3.bf16.xpose.msk.msra.mxu1 %vm6585_vm11, %v5180_v25 }
 0x3cd   : > { %v3791_v44 = vadd.f32 %v6574_v20, %v3768_v37  ;;  %5183 = vmatprep.subr.bf16.mxu1 %v5496_v27 }
 0x3ce   : > { %v5184_v6 = vpack.c.bf16 %v3805_v33, %v3804_v42  ;;  %v3790_v4 = vadd.f32 %v6574_v20, %v3767_v47  ;;  %v5131_v43 = vpop.f32.mrb[60].mxu1  ;;  %v4922_v33 = vpop.f32.mrb[127].mxu0 }
 0x3cf   : > { %v3807_v45 = vmax.f32 %v3791_v44, 0.0  ;;  %v3770_v46 = vmul.f32 %v5131_v43, %v6569_v3  ;;  %v3691_v48 = vpop.f32.mrb[61].mxu1  ;;  %v1956_v37 = vpop.f32.mrb[128].mxu0 }
 0x3d0   : > { %v3806_v49 = vmax.f32 %v3790_v4, 0.0  ;;  %v3769_v26 = vmul.f32 %v6569_v3, %v3691_v48  ;;  %v4925_v40 = vpop.f32.mrb[129].mxu0 }
 0x3d1   : > { %v3793_v51 = vadd.f32 %v6574_v20, %v3770_v46  ;;  %v1961_v42 = vpop.f32.mrb[130].mxu0 }
 0x3d2   : > { %v5188_v52 = vpack.c.bf16 %v3807_v45, %v3806_v49  ;;  %v3792_v54 = vadd.f32 %v6574_v20, %v3769_v26  ;;  %v5134_v55 = vpop.f32.mrb[62].mxu1  ;;  %v4928_v47 = vpop.f32.mrb[131].mxu0 }
 0x3d3   : > { %v3809_v56 = vmax.f32 %v3793_v51, 0.0  ;;  %v3772_v57 = vmul.f32 %v5134_v55, %v6569_v3  ;;  %v3701_v59 = vpop.f32.mrb[63].mxu1  ;;  %v1966_v44 = vpop.f32.mrb[132].mxu0 }
 0x3d4   : > { %v3808_v31 = vmax.f32 %v3792_v54, 0.0  ;;  %v3771_v60 = vmul.f32 %v6569_v3, %v3701_v59  ;;  %5186 = vmatpush3.bf16.xpose.msk.msra.mxu1 %vm6585_vm11, %v5184_v6  ;;  %v4931_v6 = vpop.f32.mrb[133].mxu0 }
 0x3d5   : > { %v3795_v61 = vadd.f32 %v6574_v20, %v3772_v57  ;;  %5187 = vmatprep.subr.bf16.mxu1 %v5496_v27 }
 0x3d6   : > { %v5192_v50 = vpack.c.bf16 %v3809_v56, %v3808_v31  ;;  %v3794_v62 = vadd.f32 %v6574_v20, %v3771_v60  ;;  %v5137_v63 = vpop.f32.mrb[64].mxu1 }
 0x3d7   : > { %v3811_v2 = vmax.f32 %v3795_v61, 0.0  ;;  %v3774_v58 = vmul.f32 %v5137_v63, %v6569_v3  ;;  %v3711_v10 = vpop.f32.mrb[65].mxu1 }
 0x3d8   : > { %v3810_v8 = vmax.f32 %v3794_v62, 0.0  ;;  %v3773_v12 = vmul.f32 %v6569_v3, %v3711_v10 }
 0x3d9   : > { %v3797_v13 = vadd.f32 %v6574_v20, %v3774_v58 }
 0x3da   : > { %v5196_v0 = vpack.c.bf16 %v3811_v2, %v3810_v8  ;;  %v3796_v14 = vadd.f32 %v6574_v20, %v3773_v12  ;;  %v5140_v15 = vpop.f32.mrb[66].mxu1 }
 0x3db   : > { %v3813_v16 = vmax.f32 %v3797_v13, 0.0  ;;  %v3776_v17 = vmul.f32 %v5140_v15, %v6569_v3  ;;  %v3721_v18 = vpop.f32.mrb[67].mxu1 }
 0x3dc   : > { %v3812_v19 = vmax.f32 %v3796_v14, 0.0  ;;  %v3775_v22 = vmul.f32 %v6569_v3, %v3721_v18  ;;  %5190 = vmatpush3.bf16.xpose.msk.msra.mxu1 %vm6585_vm11, %v5188_v52 }
 0x3dd   : > { %v3799_v28 = vadd.f32 %v6574_v20, %v3776_v17  ;;  %5191 = vmatprep.subr.bf16.mxu1 %v5496_v27 }
 0x3de   : > { %v5200_v30 = vpack.c.bf16 %v3813_v16, %v3812_v19  ;;  %v3798_v11 = vadd.f32 %v6574_v20, %v3775_v22  ;;  %v5143_v38 = vpop.f32.mrb[68].mxu1 }
 0x3df   : > { %v3815_v53 = vmax.f32 %v3799_v28, 0.0  ;;  %v3778_v34 = vmul.f32 %v5143_v38, %v6569_v3  ;;  %v3731_v36 = vpop.f32.mrb[69].mxu1 }
 0x3e0   : > { %v3814_v41 = vmax.f32 %v3798_v11, 0.0  ;;  %v3777_v39 = vmul.f32 %v6569_v3, %v3731_v36  ;;  %v3819_v3 = vand.u32 127, %v2102_v29 }
 0x3e1   : > { %v3801_v21 = vadd.f32 %v6574_v20, %v3778_v34 }
 0x3e2   : > { %v5204_v7 = vpack.c.bf16 %v3815_v53, %v3814_v41  ;;  %v3800_v9 = vadd.f32 %v6574_v20, %v3777_v39  ;;  %vm3820_vm12 = vcmp.eq.s32.totalorder %v6250_v35, %v3819_v3 }
 0x3e3   : > { %v3817_v24 = vmax.f32 %v3801_v21, 0.0  ;;  %v4303_v20 = vsel %vm3820_vm12, 1.0, %v5494_v1 }
 0x3e4   : > { %v3816_v25 = vmax.f32 %v3800_v9, 0.0  ;;  %5194 = vmatpush3.bf16.xpose.msk.msra.mxu1 %vm6585_vm11, %v5192_v50 }
 0x3e5   : > { %5195 = vmatprep.subr.bf16.mxu1 %v5496_v27 }
 0x3e6   : > { %v5208_v32 = vpack.c.bf16 %v3817_v24, %v3816_v25 }
 0x3ec   : > { %5198 = vmatpush3.bf16.xpose.msk.msra.mxu1 %vm6585_vm11, %v5196_v0 }
 0x3ed   : > { %5199 = vmatprep.subr.bf16.mxu1 %v5496_v27 }
 0x3f4   : > { %5202 = vmatpush3.bf16.xpose.msk.msra.mxu1 %vm6585_vm11, %v5200_v30 }
 0x3f5   : > { %5203 = vmatprep.subr.bf16.mxu1 %v5496_v27 }
 0x3fc   : > { %5206 = vmatpush3.bf16.xpose.msk.msra.mxu1 %vm6585_vm11, %v5204_v7 }
 0x3fd   : > { %5207 = vmatprep.subr.bf16.mxu1 %v5496_v27  ;;  %v1971_v27 = vpop.f32.mrb[134].mxu0 }
 0x3fe   : > { %v4934_v4 = vpop.f32.mrb[135].mxu0 }
 0x3ff   : > { %v1976_v29 = vpop.f32.mrb[136].mxu0 }
 0x400   : > { %v4937_v43 = vpop.f32.mrb[137].mxu0 }
 0x401   : > { %v1981_v23 = vpop.f32.mrb[138].mxu0 }
 0x402   : > { %v4940_v45 = vpop.f32.mrb[139].mxu0 }
 0x403   : > { %v1986_v35 = vpop.f32.mrb[140].mxu0 }
 0x404   : > { %5210 = vmatpush3.bf16.xpose.msk.msra.mxu1 %vm6585_vm11, %v5208_v32  ;;  %v4943_v46 = vpop.f32.mrb[141].mxu0 }
 0x405   : > { %v1991_v1 = vpop.f32.mrb[142].mxu0 }
 0x406   : > { %v4946_v48 = vpop.f32.mrb[143].mxu0 }
 0x407   : > { %v1996_v49 = vpop.f32.mrb[144].mxu0 }
 0x408   : > { %v4949_v26 = vpop.f32.mrb[145].mxu0 }
 0x409   : > { %v2001_v51 = vpop.f32.mrb[146].mxu0 }
 0x40a   : > { %v4952_v52 = vpop.f32.mrb[147].mxu0 }
 0x40b   : > { %5177 = vmatmul.mubr.msk.f32.vlgmr.msra.gmra.mrb[70].mxu1 %vm2261_vm9, %v4303_v20  ;;  %v2006_v54 = vpop.f32.mrb[148].mxu0 }
 0x40c   : > { %v4955_v55 = vpop.f32.mrb[149].mxu0 }
 0x40d   : > { %v2011_v56 = vpop.f32.mrb[150].mxu0 }
 0x40e   : > { %v4958_v57 = vpop.f32.mrb[151].mxu0 }
 0x40f   : > { %v2016_v59 = vpop.f32.mrb[152].mxu0 }
 0x410   : > { %v4961_v31 = vpop.f32.mrb[153].mxu0 }
 0x4de   : > { %v3940_v60 = vpop.f32.mrb[70].mxu1 }
 0x4df   : > { %3944 = vst [vmem:[%s354_s21] sm:$0xff] %v3940_v60  ;;  %v5178_v61 = vpop.f32.mrb[71].mxu1 }
 0x4e0   : > { %5427 = shalt.err (!%p5424_p5)
}
 0x4e1   : > { %s5428_s23 = scalar_lea.hbm %s6648_s12, 128  ;;  %s5432_s24 = scalar_lea.hbm %s6701_s8, 256 }
 0x4e2   : > { %p5429_p6 = scmp.ne.s32.totalorder %s6648_s12, %s5428_s23  ;;  %p5433_p10 = scmp.lt.u32.totalorder %s6648_s12, %s6701_s8 }
 0x4e3   : > { %p5434_p11 = scmp.lt.u32.totalorder %s5432_s24, %s5428_s23  ;;  %p5436_p13 = scmp.lt.u32.totalorder %s5428_s23, %s6648_s12 }
 0x4e4   : > { %p5430_p7 = pnand %p5429_p6, %p5583_p4 }
 0x4e5   : > { %p5435_p12 = por %p5434_p11, %p5433_p10 }
 0x4e6   : > { %p5431_p9 = pneg %p5430_p7 }
 0x4e7   : > { %p5437_p0 = por %p5436_p13, %p5435_p12 }
 0x4e9   : > { %p5438_p1 = pnand %p5437_p0, %p5431_p9 }
 0x4eb   : > { %5441 = shalt.err (!%p5438_p1)
}
 0x4ec   : > { %5342 = dma.vmem_to_hbm [thread:$0]  (%p5583_p4), %s6643_s22, 128, %s6648_s12, %s3946_s25  }
 0x4ed PF: > { %p5348_p2 = scmp.ge.s32.totalorder %s5492_s10, 2  ;;  %s3972_s14 = sand.u32 1, %s5472_s27  }
 0x4ee   : > { %s3973_s30 = scalar_lea.sflag [#allocation3], %s3972_s14 }
 0x4ef   : > { %p5345_p3 = pnand %p5348_p2, %p5590_p8 }
 0x4f1   : > { %5467 = dma.done.wait (!%p5345_p3), %s3973_s30, 128  }
 0x4f2   : > { %5469 = vsyncadd (!%p5345_p3), %s3973_s30, 4294967168  ;;  %s21_s10 = sadd.s32 1, %s5492_s10   ;;  %s6706_s27 = smov %s5476_s28 }
 0x4f3   : > { %p18_p5 = scmp.ge.s32.totalorder %s21_s10, 4   ;;  %s6707_s28 = smov %s5480_s29 }
 0x4f4   : > { %s6708_s29 = smov %s5596_s18  ;;  %s6709_s30 = smov %s5488_s9 }
 0x4f5   : > { %s6710_s9 = smov %s6712_s13  ;;  %20 = sbr.rel (!%p18_p5) target bundleno = 4 (0x4), region = 102 }
 0x4fc   :  { %3978 = vsyncpa [#allocation3], 1 }
 0x4fd   :  { %3980 = vsyncpa [#allocation3 + $0x1], 1 }

</bundles_post_ra>
